<compile_context>
chip_gen: v7x
topology: tpu7x:2x2x1
jax: 0.10.0
libtpu: 0.0.40
codegen_flags: <defaults>
</compile_context>

<pallas_src>
import math

import jax
import jax.numpy as jnp
from jax.experimental import pallas as pl
from jax.experimental.pallas import tpu as pltpu

# ----------------------------- model config ---------------------------------
DIM = 32        # feature dim
DEPTH = 2       # number of transformer layers
HEADS = 4       # attention heads
DIM_HEAD = 8    # per-head dim
MLP_DIM = 64    # hidden dim of the feed-forward
INNER = HEADS * DIM_HEAD
SCALE = DIM_HEAD ** -0.5
LN_EPS = 1e-5
DP = 128        # lane-padded width of the residual/output path (multiple of 128)

B = 2           # batch
N = 8           # sequence length (power of two -> cheap cross-batch mask)
M = B * N       # fused rows (sublane dim), multiple of 8


# ----------------------------- kernel helpers -------------------------------
def _gelu_erf(x):
    # Exact-erf GELU (torch nn.GELU default).  erf via A&S 7.1.26 polynomial,
    # |err| <= 1.5e-7, using only exp / mul / add / div / select (all VPU/EUP).
    z = x * (1.0 / math.sqrt(2.0))
    a = jnp.abs(z)
    t = 1.0 / (1.0 + 0.3275911 * a)
    poly = ((((1.061405429 * t - 1.453152027) * t + 1.421413741) * t
             - 0.284496736) * t + 0.254829592) * t
    erf_abs = 1.0 - poly * jnp.exp(-a * a)
    erf_z = jnp.where(z >= 0, erf_abs, -erf_abs)
    return 0.5 * x * (1.0 + erf_z)


# ----------------------------- fused kernel ---------------------------------
def fused_transformer_kernel(
    x_ref,                                   # (M, DP)  f32, pad lanes zero
    ln1_g_ref, ln1_b_ref,                    # (1, DP)  f32, zero-padded
    wqkv_ref,                                # (DIM, 3*INNER)  bf16 (q cols pre-scaled)
    wo_ref,                                  # (HEADS, DIM_HEAD, DP)  bf16, pad cols zero
    bo_ref,                                  # (1, DP)  f32, zero-padded
    ln2_g_ref, ln2_b_ref,                    # (1, DP)  f32
    w1_ref,                                  # (DIM, MLP_DIM)  bf16
    b1_ref,                                  # (1, MLP_DIM)    f32
    w2_ref,                                  # (MLP_DIM, DP)   bf16, pad cols zero
    b2_ref,                                  # (1, DP)  f32
    fg_ref, fb_ref,                          # (1, DP)  f32  (final LayerNorm)
    o_ref,                                   # (M, DP)  f32
    x_scr,                                   # (M, DP)  f32  VMEM activation carry
):
    f32, bf16 = jnp.float32, jnp.bfloat16
    l = pl.program_id(0)

    @pl.when(l == 0)
    def _init():
        x_scr[...] = x_ref[...]

    # ---- constants (cheap to rebuild per layer step) ----
    lane = jax.lax.broadcasted_iota(jnp.int32, (1, DP), 1)
    feat_mask = (lane < DIM).astype(f32)     # 1 on real feature lanes, 0 on pad
    inv_d = 1.0 / DIM

    def layernorm(v, g, b):
        # v: (M, DP) with pad lanes exactly zero; stats over the real DIM lanes.
        mean = jnp.sum(v, axis=-1, keepdims=True) * inv_d
        c = v - mean
        cm = c * feat_mask
        var = jnp.sum(cm * cm, axis=-1, keepdims=True) * inv_d
        # gamma/beta are zero-padded, so pad lanes stay exactly 0.
        return c * jax.lax.rsqrt(var + LN_EPS) * g + b

    # Cross-batch additive mask (token r attends to token c iff same batch).
    # N is a power of two -> batch id via right shift (no vector int division).
    shift = int(math.log2(N))
    rq = jnp.right_shift(jax.lax.broadcasted_iota(jnp.int32, (1, M, M), 1), shift)
    rk = jnp.right_shift(jax.lax.broadcasted_iota(jnp.int32, (1, M, M), 2), shift)
    neg_mask = jnp.where(rq == rk, 0.0, -1e30).astype(f32)

    x = x_scr[...]                                            # (M, DP)

    # --------------------------- attention block ---------------------------
    h = layernorm(x, ln1_g_ref[...], ln1_b_ref[...])
    h32 = h[:, :DIM].astype(bf16)                             # (M, DIM) bf16
    qkv = jnp.dot(h32, wqkv_ref[...], preferred_element_type=f32)   # (M, 3*INNER)

    def to_heads(base):
        # (M, INNER) lane chunk of qkv -> (HEADS, M, DIM_HEAD)
        parts = [
            qkv[:, base + hd * DIM_HEAD: base + (hd + 1) * DIM_HEAD]
            .reshape(1, M, DIM_HEAD)
            for hd in range(HEADS)
        ]
        return jnp.concatenate(parts, axis=0).astype(bf16)

    q3 = to_heads(0)
    k3 = to_heads(INNER)
    v3 = to_heads(2 * INNER)

    # z = HEADS only: score all M keys at once; mask cross-batch pairs.
    s = jnp.einsum('hqd,hkd->hqk', q3, k3, preferred_element_type=f32)  # (H, M, M)
    s = s + neg_mask
    s = s - jnp.max(s, axis=-1, keepdims=True)
    e = jnp.exp(s)
    p = e / jnp.sum(e, axis=-1, keepdims=True)                # exact divide (torch parity)
    o3 = jnp.einsum('hqk,hkd->hqd', p.astype(bf16), v3,
                    preferred_element_type=f32)               # (H, M, DIM_HEAD)

    # Head merge fused into the output projection: sum_h o_h @ wo_h (+ bias).
    att = jnp.einsum('hmd,hde->hme', o3.astype(bf16), wo_ref[...],
                     preferred_element_type=f32)              # (H, M, DP)
    x = x + (jnp.sum(att, axis=0) + bo_ref[...])              # residual; pads stay 0

    # -------------------------- feed-forward block --------------------------
    h = layernorm(x, ln2_g_ref[...], ln2_b_ref[...])
    h32 = h[:, :DIM].astype(bf16)
    u = jnp.dot(h32, w1_ref[...], preferred_element_type=f32) + b1_ref[...]  # (M, MLP_DIM)
    u = _gelu_erf(u)
    y = jnp.dot(u.astype(bf16), w2_ref[...], preferred_element_type=f32) + b2_ref[...]
    x = x + y                                                 # residual; pads stay 0

    x_scr[...] = x                                            # carry to next layer

    @pl.when(l == pl.num_programs(0) - 1)
    def _finalize():
        o_ref[...] = layernorm(x, fg_ref[...], fb_ref[...])


# ----------------------------- packing ---------------------------------------
def _pad_last(a, width):
    pad = width - a.shape[-1]
    if pad <= 0:
        return a
    cfg = [(0, 0)] * (a.ndim - 1) + [(0, pad)]
    return jnp.pad(a, cfg)


def pack_params(layer_params, final_g, final_b):
    """Stack per-layer weights on a DEPTH axis; bf16 matmul weights; only the
    residual/output path (wo/w2/biases/LN params) is lane-padded to DP."""
    f32, bf16 = jnp.float32, jnp.bfloat16
    ln1_g, ln1_b, wqkv, wo, bo = [], [], [], [], []
    ln2_g, ln2_b, w1, b1, w2, b2 = [], [], [], [], [], []
    for (g1, be1, wq, w_o, b_o, g2, be2, wa, ba, wb, bb) in layer_params:
        # Fold attention scale into the q columns once at pack time.
        wq = wq.at[:, :INNER].multiply(SCALE)
        ln1_g.append(_pad_last(g1, DP).astype(f32))
        ln1_b.append(_pad_last(be1, DP).astype(f32))
        wqkv.append(wq.astype(bf16))                              # (DIM, 3*INNER)
        wo_h = w_o.reshape(HEADS, DIM_HEAD, DIM)                  # per-head slabs
        wo.append(_pad_last(wo_h, DP).astype(bf16))               # (H, d, DP)
        bo.append(_pad_last(b_o, DP).astype(f32))
        ln2_g.append(_pad_last(g2, DP).astype(f32))
        ln2_b.append(_pad_last(be2, DP).astype(f32))
        w1.append(wa.astype(bf16))                                # (DIM, MLP_DIM)
        b1.append(ba.astype(f32))                                 # (1, MLP_DIM)
        w2.append(_pad_last(wb, DP).astype(bf16))                 # (MLP_DIM, DP)
        b2.append(_pad_last(bb, DP).astype(f32))
    stk = lambda xs: jnp.stack(xs, axis=0)
    return (stk(ln1_g), stk(ln1_b), stk(wqkv), stk(wo), stk(bo),
            stk(ln2_g), stk(ln2_b), stk(w1), stk(b1), stk(w2), stk(b2),
            _pad_last(final_g, DP).astype(f32), _pad_last(final_b, DP).astype(f32))


# ----------------------------- wrapper ----------------------------------------
@jax.jit
def transformer_forward(x, packed):
    (ln1_g, ln1_b, wqkv, wo, bo, ln2_g, ln2_b, w1, b1, w2, b2, fg, fb) = packed
    b_, n_, d_ = x.shape
    rows = b_ * n_
    xp = jnp.zeros((rows, DP), jnp.float32).at[:, :d_].set(x.reshape(rows, d_))
    args = (xp, ln1_g, ln1_b, wqkv, wo, bo, ln2_g, ln2_b, w1, b1, w2, b2, fg, fb)

    def shared_spec(shape):                     # same block every grid step
        nd = len(shape)
        return pl.BlockSpec(tuple(int(s) for s in shape),
                            lambda l, _n=nd: (0,) * _n)

    def layer_spec(shape):                      # stream layer l's slab
        rest = tuple(int(s) for s in shape[1:])
        nrest = len(rest)
        return pl.BlockSpec((None,) + rest,
                            lambda l, _n=nrest: (l,) + (0,) * _n)

    in_specs = [shared_spec(xp.shape)]
    in_specs += [layer_spec(a.shape) for a in
                 (ln1_g, ln1_b, wqkv, wo, bo, ln2_g, ln2_b, w1, b1, w2, b2)]
    in_specs += [shared_spec(fg.shape), shared_spec(fb.shape)]

    flops = DEPTH * (2 * rows * DIM * 3 * INNER
                     + 2 * HEADS * rows * rows * DIM_HEAD * 2
                     + 2 * rows * INNER * DP
                     + 2 * rows * DIM * MLP_DIM
                     + 2 * rows * MLP_DIM * DP)
    transcendentals = DEPTH * (HEADS * rows * rows + rows * MLP_DIM)
    bytes_accessed = int(sum(int(a.size) * a.dtype.itemsize for a in args)
                         + rows * DP * 4)

    out = pl.pallas_call(
        fused_transformer_kernel,
        out_shape=jax.ShapeDtypeStruct((rows, DP), jnp.float32),
        grid=(DEPTH,),
        in_specs=in_specs,
        out_specs=shared_spec((rows, DP)),
        scratch_shapes=[pltpu.VMEM((rows, DP), jnp.float32)],
        compiler_params=pltpu.CompilerParams(
            dimension_semantics=("arbitrary",),      # sequential layer carry
            vmem_limit_bytes=32 * 1024 * 1024,       # v7x-safe (64 MiB physical)
        ),
        cost_estimate=pl.CostEstimate(
            flops=int(flops),
            transcendentals=int(transcendentals),
            bytes_accessed=bytes_accessed,
        ),
    )(*args)
    return out[:, :d_].reshape(b_, n_, d_)


# ----------------------------- reference (pure JAX, f32) ----------------------
def _gelu_exact_ref(x):
    return 0.5 * x * (1.0 + jax.lax.erf(x * (1.0 / math.sqrt(2.0))))


def _ref_layernorm(x, g, b):
    mu = jnp.mean(x, axis=-1, keepdims=True)
    var = jnp.mean((x - mu) ** 2, axis=-1, keepdims=True)
    return (x - mu) * jax.lax.rsqrt(var + LN_EPS) * g + b


def transformer_reference(x, layer_params, final_g, final_b):
    for (ln1_g, ln1_b, wqkv, wo, bo, ln2_g, ln2_b, w1, b1, w2, b2) in layer_params:
        h = _ref_layernorm(x, ln1_g[0], ln1_b[0])
        qkv = h @ wqkv
        q, k, v = jnp.split(qkv, 3, axis=-1)

        def to_heads(t):
            return t.reshape(t.shape[0], t.shape[1], HEADS, DIM_HEAD).transpose(0, 2, 1, 3)

        q, k, v = map(to_heads, (q, k, v))
        dots = jnp.einsum("bhnd,bhmd->bhnm", q, k) * SCALE
        attn = jax.nn.softmax(dots, axis=-1)
        out = jnp.einsum("bhnm,bhmd->bhnd", attn, v)
        out = out.transpose(0, 2, 1, 3).reshape(x.shape[0], x.shape[1], INNER)
        x = x + (out @ wo + bo[0])
        h2 = _ref_layernorm(x, ln2_g[0], ln2_b[0])
        h2 = _gelu_exact_ref(h2 @ w1 + b1[0])
        x = x + (h2 @ w2 + b2[0])
    return _ref_layernorm(x, final_g[0], final_b[0])


# ----------------------------- param init ------------------------------------
def init_params(key):
    layer_params = []
    for _ in range(DEPTH):
        keys = jax.random.split(key, 6)
        key = keys[-1]
        ln1_g = jnp.ones((1, DIM), jnp.float32)
        ln1_b = jnp.zeros((1, DIM), jnp.float32)
        wqkv = jax.random.normal(keys[0], (DIM, 3 * INNER), jnp.float32) * 0.05
        wo = jax.random.normal(keys[1], (INNER, DIM), jnp.float32) * 0.05
        bo = jax.random.normal(keys[2], (1, DIM), jnp.float32) * 0.05
        ln2_g = jnp.ones((1, DIM), jnp.float32)
        ln2_b = jnp.zeros((1, DIM), jnp.float32)
        w1 = jax.random.normal(keys[3], (DIM, MLP_DIM), jnp.float32) * 0.05
        b1 = jnp.zeros((1, MLP_DIM), jnp.float32)
        w2 = jax.random.normal(keys[4], (MLP_DIM, DIM), jnp.float32) * 0.05
        b2 = jnp.zeros((1, DIM), jnp.float32)
        layer_params.append((ln1_g, ln1_b, wqkv, wo, bo,
                             ln2_g, ln2_b, w1, b1, w2, b2))
    final_g = jnp.ones((1, DIM), jnp.float32)
    final_b = jnp.zeros((1, DIM), jnp.float32)
    return layer_params, final_g, final_b


# ----------------------------- main -------------------------------------------
if __name__ == "__main__":
    key = jax.random.PRNGKey(0)
    kx, kp = jax.random.split(key)
    x = jax.random.normal(kx, (B, N, DIM), jnp.float32)
    layer_params, final_g, final_b = init_params(kp)

    packed = pack_params(layer_params, final_g, final_b)
    out = transformer_forward(x, packed)
    out = jax.block_until_ready(out)

    ref = transformer_reference(x, layer_params, final_g, final_b)
    assert out.shape == (B, N, DIM)
    # bf16 matmul operands (f32 accumulation) give ~1e-3-level differences vs.
    # the pure-f32 reference; 2e-2 leaves comfortable margin.
    assert jnp.allclose(out, ref, atol=2e-2, rtol=2e-2), "mismatch vs. reference"

    print("KERNEL_OK")
</pallas_src>

<mosaic_0001>
module attributes {stable_mosaic.version = 11 : i64} {
  func.func @fused_transformer_kernel(%arg0: i32, %arg1: memref<16x128xf32, #tpu.memory_space<vmem>>, %arg2: memref<1x1x128xf32, #tpu.memory_space<vmem>>, %arg3: memref<1x1x128xf32, #tpu.memory_space<vmem>>, %arg4: memref<1x32x96xbf16, #tpu.memory_space<vmem>>, %arg5: memref<1x4x8x128xbf16, #tpu.memory_space<vmem>>, %arg6: memref<1x1x128xf32, #tpu.memory_space<vmem>>, %arg7: memref<1x1x128xf32, #tpu.memory_space<vmem>>, %arg8: memref<1x1x128xf32, #tpu.memory_space<vmem>>, %arg9: memref<1x32x64xbf16, #tpu.memory_space<vmem>>, %arg10: memref<1x1x64xf32, #tpu.memory_space<vmem>>, %arg11: memref<1x64x128xbf16, #tpu.memory_space<vmem>>, %arg12: memref<1x1x128xf32, #tpu.memory_space<vmem>>, %arg13: memref<1x128xf32, #tpu.memory_space<vmem>>, %arg14: memref<1x128xf32, #tpu.memory_space<vmem>>, %arg15: memref<16x128xf32, #tpu.memory_space<vmem>>, %arg16: memref<16x128xf32, #tpu.memory_space<vmem>>) attributes {dimension_semantics = [#tpu.dimension_semantics<arbitrary>], iteration_bounds = array<i64: 2>, scalar_prefetch = 0 : i64, scratch_operands = 1 : i64, tpu.core_type = #tpu.core_type<tc>, window_params = [{pipeline_mode = #tpu.pipeline_mode<synchronous>, transform_indices = @transform_0, window_bounds = array<i64: 16, 128>}, {transform_indices = @transform_1, window_bounds = array<i64: 1, 1, 128>}, {transform_indices = @transform_2, window_bounds = array<i64: 1, 1, 128>}, {transform_indices = @transform_3, window_bounds = array<i64: 1, 32, 96>}, {transform_indices = @transform_4, window_bounds = array<i64: 1, 4, 8, 128>}, {transform_indices = @transform_5, window_bounds = array<i64: 1, 1, 128>}, {transform_indices = @transform_6, window_bounds = array<i64: 1, 1, 128>}, {transform_indices = @transform_7, window_bounds = array<i64: 1, 1, 128>}, {transform_indices = @transform_8, window_bounds = array<i64: 1, 32, 64>}, {transform_indices = @transform_9, window_bounds = array<i64: 1, 1, 64>}, {transform_indices = @transform_10, window_bounds = array<i64: 1, 64, 128>}, {transform_indices = @transform_11, window_bounds = array<i64: 1, 1, 128>}, {pipeline_mode = #tpu.pipeline_mode<synchronous>, transform_indices = @transform_12, window_bounds = array<i64: 1, 128>}, {pipeline_mode = #tpu.pipeline_mode<synchronous>, transform_indices = @transform_13, window_bounds = array<i64: 1, 128>}, {pipeline_mode = #tpu.pipeline_mode<synchronous>, transform_indices = @transform_14, window_bounds = array<i64: 16, 128>}]} {
    %c0_i32 = arith.constant 0 : i32
    %0 = arith.cmpi eq, %arg0, %c0_i32 : i32
    %1 = arith.extui %0 : i1 to i32
    %c0_i32_0 = arith.constant 0 : i32
    %2 = arith.cmpi ne, %1, %c0_i32_0 : i32
    scf.if %2 {
      %c0_75 = arith.constant 0 : index
      %c0_76 = arith.constant 0 : index
      %192 = vector.load %arg1[%c0_75, %c0_76] : memref<16x128xf32, #tpu.memory_space<vmem>>, vector<16x128xf32>
      %c0_77 = arith.constant 0 : index
      %c0_78 = arith.constant 0 : index
      %193 = vector.load %arg16[%c0_77, %c0_78] : memref<16x128xf32, #tpu.memory_space<vmem>>, vector<16x128xf32>
      tpu.vector_store %arg16[%c0_77, %c0_78], %192 {strides = array<i32>} : memref<16x128xf32, #tpu.memory_space<vmem>>, vector<16x128xf32>,
    } else {
    }
    %3 = tpu.iota {dimensions = array<i32: 1>} : vector<1x128xi32>
    %c32_i32 = arith.constant 32 : i32
    %4 = vector.broadcast %c32_i32 : i32 to vector<1x128xi32>
    %5 = arith.cmpi slt, %3, %4 : vector<1x128xi32>
    %6 = arith.extui %5 : vector<1x128xi1> to vector<1x128xi32>
    %7 = arith.sitofp %6 : vector<1x128xi32> to vector<1x128xf32>
    %8 = tpu.iota {dimensions = array<i32: 1>} : vector<1x16x16xi32>
    %c3_i32 = arith.constant 3 : i32
    %9 = vector.broadcast %c3_i32 : i32 to vector<1x16x16xi32>
    %10 = arith.shrsi %8, %9 : vector<1x16x16xi32>
    %11 = tpu.iota {dimensions = array<i32: 2>} : vector<1x16x16xi32>
    %c3_i32_1 = arith.constant 3 : i32
    %12 = vector.broadcast %c3_i32_1 : i32 to vector<1x16x16xi32>
    %13 = arith.shrsi %11, %12 : vector<1x16x16xi32>
    %14 = arith.cmpi eq, %10, %13 : vector<1x16x16xi32>
    %cst = arith.constant 0.000000e+00 : f32
    %cst_2 = arith.constant -1.000000e+30 : f32
    %15 = vector.broadcast %cst : f32 to vector<1x16x16xf32>
    %16 = vector.broadcast %cst_2 : f32 to vector<1x16x16xf32>
    %17 = arith.select %14, %15, %16 : vector<1x16x16xi1>, vector<1x16x16xf32>
    %c0 = arith.constant 0 : index
    %c0_3 = arith.constant 0 : index
    %18 = vector.load %arg16[%c0, %c0_3] : memref<16x128xf32, #tpu.memory_space<vmem>>, vector<16x128xf32>
    %c0_4 = arith.constant 0 : index
    %c0_5 = arith.constant 0 : index
    %c0_6 = arith.constant 0 : index
    %19 = vector.load %arg2[%c0_4, %c0_5, %c0_6] : memref<1x1x128xf32, #tpu.memory_space<vmem>>, vector<1x1x128xf32>
    %20 = vector.shape_cast %19 : vector<1x1x128xf32> to vector<1x128xf32>
    %c0_7 = arith.constant 0 : index
    %c0_8 = arith.constant 0 : index
    %c0_9 = arith.constant 0 : index
    %21 = vector.load %arg3[%c0_7, %c0_8, %c0_9] : memref<1x1x128xf32, #tpu.memory_space<vmem>>, vector<1x1x128xf32>
    %22 = vector.shape_cast %21 : vector<1x1x128xf32> to vector<1x128xf32>
    %cst_10 = arith.constant dense<0.000000e+00> : vector<16xf32>
    %23 = vector.multi_reduction <add>, %18, %cst_10 [1] : vector<16x128xf32> to vector<16xf32>
    %24 = vector.shape_cast %23 : vector<16xf32> to vector<16x1xf32>
    %cst_11 = arith.constant 3.125000e-02 : f32
    %25 = vector.broadcast %cst_11 : f32 to vector<16x1xf32>
    %26 = arith.mulf %24, %25 : vector<16x1xf32>
    %27 = vector.broadcast %26 : vector<16x1xf32> to vector<16x128xf32>
    %28 = arith.subf %18, %27 : vector<16x128xf32>
    %29 = vector.broadcast %7 : vector<1x128xf32> to vector<16x128xf32>
    %30 = arith.mulf %28, %29 : vector<16x128xf32>
    %31 = arith.mulf %30, %30 : vector<16x128xf32>
    %cst_12 = arith.constant dense<0.000000e+00> : vector<16xf32>
    %32 = vector.multi_reduction <add>, %31, %cst_12 [1] : vector<16x128xf32> to vector<16xf32>
    %33 = vector.shape_cast %32 : vector<16xf32> to vector<16x1xf32>
    %cst_13 = arith.constant 3.125000e-02 : f32
    %34 = vector.broadcast %cst_13 : f32 to vector<16x1xf32>
    %35 = arith.mulf %33, %34 : vector<16x1xf32>
    %cst_14 = arith.constant 9.99999974E-6 : f32
    %36 = vector.broadcast %cst_14 : f32 to vector<16x1xf32>
    %37 = arith.addf %35, %36 : vector<16x1xf32>
    %38 = math.rsqrt %37 : vector<16x1xf32>
    %39 = vector.broadcast %38 : vector<16x1xf32> to vector<16x128xf32>
    %40 = arith.mulf %28, %39 : vector<16x128xf32>
    %41 = vector.broadcast %20 : vector<1x128xf32> to vector<16x128xf32>
    %42 = arith.mulf %40, %41 : vector<16x128xf32>
    %43 = vector.broadcast %22 : vector<1x128xf32> to vector<16x128xf32>
    %44 = arith.addf %42, %43 : vector<16x128xf32>
    %45 = vector.extract_strided_slice %44 {offsets = [0, 0], sizes = [16, 32], strides = [1, 1]} : vector<16x128xf32> to vector<16x32xf32>
    %46 = arith.truncf %45 : vector<16x32xf32> to vector<16x32xbf16>
    %c0_15 = arith.constant 0 : index
    %c0_16 = arith.constant 0 : index
    %c0_17 = arith.constant 0 : index
    %47 = vector.load %arg4[%c0_15, %c0_16, %c0_17] : memref<1x32x96xbf16, #tpu.memory_space<vmem>>, vector<1x32x96xbf16>
    %48 = vector.shape_cast %47 : vector<1x32x96xbf16> to vector<32x96xbf16>
    %cst_18 = arith.constant dense<0.000000e+00> : vector<16x96xf32>
    %49 = tpu.matmul %46, %48, %cst_18 {dimension_numbers = #tpu.dot_dimension_numbers<[1], [0], [0], [1], [0, 0, 1, 1], [], []>} : vector<16x32xbf16>, vector<32x96xbf16>, vector<16x96xf32> -> vector<16x96xf32>
    %50 = vector.extract_strided_slice %49 {offsets = [0, 0], sizes = [16, 8], strides = [1, 1]} : vector<16x96xf32> to vector<16x8xf32>
    %51 = vector.shape_cast %50 : vector<16x8xf32> to vector<1x16x8xf32>
    %52 = vector.extract_strided_slice %49 {offsets = [0, 8], sizes = [16, 8], strides = [1, 1]} : vector<16x96xf32> to vector<16x8xf32>
    %53 = vector.shape_cast %52 : vector<16x8xf32> to vector<1x16x8xf32>
    %54 = vector.extract_strided_slice %49 {offsets = [0, 16], sizes = [16, 8], strides = [1, 1]} : vector<16x96xf32> to vector<16x8xf32>
    %55 = vector.shape_cast %54 : vector<16x8xf32> to vector<1x16x8xf32>
    %56 = vector.extract_strided_slice %49 {offsets = [0, 24], sizes = [16, 8], strides = [1, 1]} : vector<16x96xf32> to vector<16x8xf32>
    %57 = vector.shape_cast %56 : vector<16x8xf32> to vector<1x16x8xf32>
    %58 = tpu.concatenate %51, %53, %55, %57 in 0 : vector<1x16x8xf32>, vector<1x16x8xf32>, vector<1x16x8xf32>, vector<1x16x8xf32> -> vector<4x16x8xf32>
    %59 = arith.truncf %58 : vector<4x16x8xf32> to vector<4x16x8xbf16>
    %60 = vector.extract_strided_slice %49 {offsets = [0, 32], sizes = [16, 8], strides = [1, 1]} : vector<16x96xf32> to vector<16x8xf32>
    %61 = vector.shape_cast %60 : vector<16x8xf32> to vector<1x16x8xf32>
    %62 = vector.extract_strided_slice %49 {offsets = [0, 40], sizes = [16, 8], strides = [1, 1]} : vector<16x96xf32> to vector<16x8xf32>
    %63 = vector.shape_cast %62 : vector<16x8xf32> to vector<1x16x8xf32>
    %64 = vector.extract_strided_slice %49 {offsets = [0, 48], sizes = [16, 8], strides = [1, 1]} : vector<16x96xf32> to vector<16x8xf32>
    %65 = vector.shape_cast %64 : vector<16x8xf32> to vector<1x16x8xf32>
    %66 = vector.extract_strided_slice %49 {offsets = [0, 56], sizes = [16, 8], strides = [1, 1]} : vector<16x96xf32> to vector<16x8xf32>
    %67 = vector.shape_cast %66 : vector<16x8xf32> to vector<1x16x8xf32>
    %68 = tpu.concatenate %61, %63, %65, %67 in 0 : vector<1x16x8xf32>, vector<1x16x8xf32>, vector<1x16x8xf32>, vector<1x16x8xf32> -> vector<4x16x8xf32>
    %69 = arith.truncf %68 : vector<4x16x8xf32> to vector<4x16x8xbf16>
    %70 = vector.extract_strided_slice %49 {offsets = [0, 64], sizes = [16, 8], strides = [1, 1]} : vector<16x96xf32> to vector<16x8xf32>
    %71 = vector.shape_cast %70 : vector<16x8xf32> to vector<1x16x8xf32>
    %72 = vector.extract_strided_slice %49 {offsets = [0, 72], sizes = [16, 8], strides = [1, 1]} : vector<16x96xf32> to vector<16x8xf32>
    %73 = vector.shape_cast %72 : vector<16x8xf32> to vector<1x16x8xf32>
    %74 = vector.extract_strided_slice %49 {offsets = [0, 80], sizes = [16, 8], strides = [1, 1]} : vector<16x96xf32> to vector<16x8xf32>
    %75 = vector.shape_cast %74 : vector<16x8xf32> to vector<1x16x8xf32>
    %76 = vector.extract_strided_slice %49 {offsets = [0, 88], sizes = [16, 8], strides = [1, 1]} : vector<16x96xf32> to vector<16x8xf32>
    %77 = vector.shape_cast %76 : vector<16x8xf32> to vector<1x16x8xf32>
    %78 = tpu.concatenate %71, %73, %75, %77 in 0 : vector<1x16x8xf32>, vector<1x16x8xf32>, vector<1x16x8xf32>, vector<1x16x8xf32> -> vector<4x16x8xf32>
    %79 = arith.truncf %78 : vector<4x16x8xf32> to vector<4x16x8xbf16>
    "tpu.trace_start"() <{level = 10 : i32, message = "hqd,hkd->hqk"}> : () -> ()
    %cst_19 = arith.constant dense<0.000000e+00> : vector<4x16x16xf32>
    %80 = tpu.matmul %59, %69, %cst_19 {dimension_numbers = #tpu.dot_dimension_numbers<[2], [2], [1], [1], [0, 0, 0, 1, 1, 1], [0], [0]>} : vector<4x16x8xbf16>, vector<4x16x8xbf16>, vector<4x16x16xf32> -> vector<4x16x16xf32>
    "tpu.trace_stop"() : () -> ()
    %81 = vector.broadcast %17 : vector<1x16x16xf32> to vector<4x16x16xf32>
    %82 = arith.addf %80, %81 : vector<4x16x16xf32>
    %cst_20 = arith.constant dense<0xFF800000> : vector<4x16xf32>
    %83 = vector.multi_reduction <maximumf>, %82, %cst_20 [2] : vector<4x16x16xf32> to vector<4x16xf32>
    %84 = vector.shape_cast %83 : vector<4x16xf32> to vector<4x16x1xf32>
    %85 = vector.broadcast %84 : vector<4x16x1xf32> to vector<4x16x16xf32>
    %86 = arith.subf %82, %85 : vector<4x16x16xf32>
    %87 = math.exp %86 : vector<4x16x16xf32>
    %cst_21 = arith.constant dense<0.000000e+00> : vector<4x16xf32>
    %88 = vector.multi_reduction <add>, %87, %cst_21 [2] : vector<4x16x16xf32> to vector<4x16xf32>
    %89 = vector.shape_cast %88 : vector<4x16xf32> to vector<4x16x1xf32>
    %90 = vector.broadcast %89 : vector<4x16x1xf32> to vector<4x16x16xf32>
    %91 = arith.divf %87, %90 : vector<4x16x16xf32>
    %92 = arith.truncf %91 : vector<4x16x16xf32> to vector<4x16x16xbf16>
    "tpu.trace_start"() <{level = 10 : i32, message = "hqk,hkd->hqd"}> : () -> ()
    %cst_22 = arith.constant dense<0.000000e+00> : vector<4x16x8xf32>
    %93 = tpu.matmul %92, %79, %cst_22 {dimension_numbers = #tpu.dot_dimension_numbers<[2], [1], [1], [2], [0, 0, 0, 1, 1, 2], [0], [0]>} : vector<4x16x16xbf16>, vector<4x16x8xbf16>, vector<4x16x8xf32> -> vector<4x16x8xf32>
    "tpu.trace_stop"() : () -> ()
    %94 = arith.truncf %93 : vector<4x16x8xf32> to vector<4x16x8xbf16>
    %c0_23 = arith.constant 0 : index
    %c0_24 = arith.constant 0 : index
    %c0_25 = arith.constant 0 : index
    %c0_26 = arith.constant 0 : index
    %95 = vector.load %arg5[%c0_23, %c0_24, %c0_25, %c0_26] : memref<1x4x8x128xbf16, #tpu.memory_space<vmem>>, vector<1x4x8x128xbf16>
    %96 = vector.shape_cast %95 : vector<1x4x8x128xbf16> to vector<4x8x128xbf16>
    "tpu.trace_start"() <{level = 10 : i32, message = "hmd,hde->hme"}> : () -> ()
    %cst_27 = arith.constant dense<0.000000e+00> : vector<4x16x128xf32>
    %97 = tpu.matmul %94, %96, %cst_27 {dimension_numbers = #tpu.dot_dimension_numbers<[2], [1], [1], [2], [0, 0, 0, 1, 1, 2], [0], [0]>} : vector<4x16x8xbf16>, vector<4x8x128xbf16>, vector<4x16x128xf32> -> vector<4x16x128xf32>
    "tpu.trace_stop"() : () -> ()
    %cst_28 = arith.constant dense<0.000000e+00> : vector<16x128xf32>
    %98 = vector.multi_reduction <add>, %97, %cst_28 [0] : vector<4x16x128xf32> to vector<16x128xf32>
    %c0_29 = arith.constant 0 : index
    %c0_30 = arith.constant 0 : index
    %c0_31 = arith.constant 0 : index
    %99 = vector.load %arg6[%c0_29, %c0_30, %c0_31] : memref<1x1x128xf32, #tpu.memory_space<vmem>>, vector<1x1x128xf32>
    %100 = vector.shape_cast %99 : vector<1x1x128xf32> to vector<1x128xf32>
    %101 = vector.broadcast %100 : vector<1x128xf32> to vector<16x128xf32>
    %102 = arith.addf %98, %101 : vector<16x128xf32>
    %103 = arith.addf %18, %102 : vector<16x128xf32>
    %c0_32 = arith.constant 0 : index
    %c0_33 = arith.constant 0 : index
    %c0_34 = arith.constant 0 : index
    %104 = vector.load %arg7[%c0_32, %c0_33, %c0_34] : memref<1x1x128xf32, #tpu.memory_space<vmem>>, vector<1x1x128xf32>
    %105 = vector.shape_cast %104 : vector<1x1x128xf32> to vector<1x128xf32>
    %c0_35 = arith.constant 0 : index
    %c0_36 = arith.constant 0 : index
    %c0_37 = arith.constant 0 : index
    %106 = vector.load %arg8[%c0_35, %c0_36, %c0_37] : memref<1x1x128xf32, #tpu.memory_space<vmem>>, vector<1x1x128xf32>
    %107 = vector.shape_cast %106 : vector<1x1x128xf32> to vector<1x128xf32>
    %cst_38 = arith.constant dense<0.000000e+00> : vector<16xf32>
    %108 = vector.multi_reduction <add>, %103, %cst_38 [1] : vector<16x128xf32> to vector<16xf32>
    %109 = vector.shape_cast %108 : vector<16xf32> to vector<16x1xf32>
    %cst_39 = arith.constant 3.125000e-02 : f32
    %110 = vector.broadcast %cst_39 : f32 to vector<16x1xf32>
    %111 = arith.mulf %109, %110 : vector<16x1xf32>
    %112 = vector.broadcast %111 : vector<16x1xf32> to vector<16x128xf32>
    %113 = arith.subf %103, %112 : vector<16x128xf32>
    %114 = vector.broadcast %7 : vector<1x128xf32> to vector<16x128xf32>
    %115 = arith.mulf %113, %114 : vector<16x128xf32>
    %116 = arith.mulf %115, %115 : vector<16x128xf32>
    %cst_40 = arith.constant dense<0.000000e+00> : vector<16xf32>
    %117 = vector.multi_reduction <add>, %116, %cst_40 [1] : vector<16x128xf32> to vector<16xf32>
    %118 = vector.shape_cast %117 : vector<16xf32> to vector<16x1xf32>
    %cst_41 = arith.constant 3.125000e-02 : f32
    %119 = vector.broadcast %cst_41 : f32 to vector<16x1xf32>
    %120 = arith.mulf %118, %119 : vector<16x1xf32>
    %cst_42 = arith.constant 9.99999974E-6 : f32
    %121 = vector.broadcast %cst_42 : f32 to vector<16x1xf32>
    %122 = arith.addf %120, %121 : vector<16x1xf32>
    %123 = math.rsqrt %122 : vector<16x1xf32>
    %124 = vector.broadcast %123 : vector<16x1xf32> to vector<16x128xf32>
    %125 = arith.mulf %113, %124 : vector<16x128xf32>
    %126 = vector.broadcast %105 : vector<1x128xf32> to vector<16x128xf32>
    %127 = arith.mulf %125, %126 : vector<16x128xf32>
    %128 = vector.broadcast %107 : vector<1x128xf32> to vector<16x128xf32>
    %129 = arith.addf %127, %128 : vector<16x128xf32>
    %130 = vector.extract_strided_slice %129 {offsets = [0, 0], sizes = [16, 32], strides = [1, 1]} : vector<16x128xf32> to vector<16x32xf32>
    %131 = arith.truncf %130 : vector<16x32xf32> to vector<16x32xbf16>
    %c0_43 = arith.constant 0 : index
    %c0_44 = arith.constant 0 : index
    %c0_45 = arith.constant 0 : index
    %132 = vector.load %arg9[%c0_43, %c0_44, %c0_45] : memref<1x32x64xbf16, #tpu.memory_space<vmem>>, vector<1x32x64xbf16>
    %133 = vector.shape_cast %132 : vector<1x32x64xbf16> to vector<32x64xbf16>
    %cst_46 = arith.constant dense<0.000000e+00> : vector<16x64xf32>
    %134 = tpu.matmul %131, %133, %cst_46 {dimension_numbers = #tpu.dot_dimension_numbers<[1], [0], [0], [1], [0, 0, 1, 1], [], []>} : vector<16x32xbf16>, vector<32x64xbf16>, vector<16x64xf32> -> vector<16x64xf32>
    %c0_47 = arith.constant 0 : index
    %c0_48 = arith.constant 0 : index
    %c0_49 = arith.constant 0 : index
    %135 = vector.load %arg10[%c0_47, %c0_48, %c0_49] : memref<1x1x64xf32, #tpu.memory_space<vmem>>, vector<1x1x64xf32>
    %136 = vector.shape_cast %135 : vector<1x1x64xf32> to vector<1x64xf32>
    %137 = vector.broadcast %136 : vector<1x64xf32> to vector<16x64xf32>
    %138 = arith.addf %134, %137 : vector<16x64xf32>
    %cst_50 = arith.constant 0.707106769 : f32
    %139 = vector.broadcast %cst_50 : f32 to vector<16x64xf32>
    %140 = arith.mulf %138, %139 : vector<16x64xf32>
    %141 = math.absf %140 : vector<16x64xf32>
    %cst_51 = arith.constant 0.327591091 : f32
    %142 = vector.broadcast %cst_51 : f32 to vector<16x64xf32>
    %143 = arith.mulf %142, %141 : vector<16x64xf32>
    %cst_52 = arith.constant 1.000000e+00 : f32
    %144 = vector.broadcast %cst_52 : f32 to vector<16x64xf32>
    %145 = arith.addf %144, %143 : vector<16x64xf32>
    %cst_53 = arith.constant 1.000000e+00 : f32
    %146 = vector.broadcast %cst_53 : f32 to vector<16x64xf32>
    %147 = arith.divf %146, %145 : vector<16x64xf32>
    %cst_54 = arith.constant 1.06140542 : f32
    %148 = vector.broadcast %cst_54 : f32 to vector<16x64xf32>
    %149 = arith.mulf %148, %147 : vector<16x64xf32>
    %cst_55 = arith.constant 1.45315206 : f32
    %150 = vector.broadcast %cst_55 : f32 to vector<16x64xf32>
    %151 = arith.subf %149, %150 : vector<16x64xf32>
    %152 = arith.mulf %151, %147 : vector<16x64xf32>
    %cst_56 = arith.constant 1.42141378 : f32
    %153 = vector.broadcast %cst_56 : f32 to vector<16x64xf32>
    %154 = arith.addf %152, %153 : vector<16x64xf32>
    %155 = arith.mulf %154, %147 : vector<16x64xf32>
    %cst_57 = arith.constant 0.284496725 : f32
    %156 = vector.broadcast %cst_57 : f32 to vector<16x64xf32>
    %157 = arith.subf %155, %156 : vector<16x64xf32>
    %158 = arith.mulf %157, %147 : vector<16x64xf32>
    %cst_58 = arith.constant 0.254829586 : f32
    %159 = vector.broadcast %cst_58 : f32 to vector<16x64xf32>
    %160 = arith.addf %158, %159 : vector<16x64xf32>
    %161 = arith.mulf %160, %147 : vector<16x64xf32>
    %cst_59 = arith.constant 0.000000e+00 : f32
    %162 = vector.broadcast %cst_59 : f32 to vector<16x64xf32>
    %163 = arith.subf %162, %141 : vector<16x64xf32>
    %164 = arith.mulf %163, %141 : vector<16x64xf32>
    %165 = math.exp %164 : vector<16x64xf32>
    %166 = arith.mulf %161, %165 : vector<16x64xf32>
    %cst_60 = arith.constant 1.000000e+00 : f32
    %167 = vector.broadcast %cst_60 : f32 to vector<16x64xf32>
    %168 = arith.subf %167, %166 : vector<16x64xf32>
    %cst_61 = arith.constant 0.000000e+00 : f32
    %169 = vector.broadcast %cst_61 : f32 to vector<16x64xf32>
    %170 = arith.cmpf oge, %140, %169 : vector<16x64xf32>
    %cst_62 = arith.constant 0.000000e+00 : f32
    %171 = vector.broadcast %cst_62 : f32 to vector<16x64xf32>
    %172 = arith.subf %171, %168 : vector<16x64xf32>
    %173 = arith.select %170, %168, %172 : vector<16x64xi1>, vector<16x64xf32>
    %cst_63 = arith.constant 5.000000e-01 : f32
    %174 = vector.broadcast %cst_63 : f32 to vector<16x64xf32>
    %175 = arith.mulf %174, %138 : vector<16x64xf32>
    %cst_64 = arith.constant 1.000000e+00 : f32
    %176 = vector.broadcast %cst_64 : f32 to vector<16x64xf32>
    %177 = arith.addf %176, %173 : vector<16x64xf32>
    %178 = arith.mulf %175, %177 : vector<16x64xf32>
    %179 = arith.truncf %178 : vector<16x64xf32> to vector<16x64xbf16>
    %c0_65 = arith.constant 0 : index
    %c0_66 = arith.constant 0 : index
    %c0_67 = arith.constant 0 : index
    %180 = vector.load %arg11[%c0_65, %c0_66, %c0_67] : memref<1x64x128xbf16, #tpu.memory_space<vmem>>, vector<1x64x128xbf16>
    %181 = vector.shape_cast %180 : vector<1x64x128xbf16> to vector<64x128xbf16>
    %cst_68 = arith.constant dense<0.000000e+00> : vector<16x128xf32>
    %182 = tpu.matmul %179, %181, %cst_68 {dimension_numbers = #tpu.dot_dimension_numbers<[1], [0], [0], [1], [0, 0, 1, 1], [], []>} : vector<16x64xbf16>, vector<64x128xbf16>, vector<16x128xf32> -> vector<16x128xf32>
    %c0_69 = arith.constant 0 : index
    %c0_70 = arith.constant 0 : index
    %c0_71 = arith.constant 0 : index
    %183 = vector.load %arg12[%c0_69, %c0_70, %c0_71] : memref<1x1x128xf32, #tpu.memory_space<vmem>>, vector<1x1x128xf32>
    %184 = vector.shape_cast %183 : vector<1x1x128xf32> to vector<1x128xf32>
    %185 = vector.broadcast %184 : vector<1x128xf32> to vector<16x128xf32>
    %186 = arith.addf %182, %185 : vector<16x128xf32>
    %187 = arith.addf %103, %186 : vector<16x128xf32>
    %c0_72 = arith.constant 0 : index
    %c0_73 = arith.constant 0 : index
    %188 = vector.load %arg16[%c0_72, %c0_73] : memref<16x128xf32, #tpu.memory_space<vmem>>, vector<16x128xf32>
    tpu.vector_store %arg16[%c0_72, %c0_73], %187 {strides = array<i32>} : memref<16x128xf32, #tpu.memory_space<vmem>>, vector<16x128xf32>,
    %c1_i32 = arith.constant 1 : i32
    %189 = arith.cmpi eq, %arg0, %c1_i32 : i32
    %190 = arith.extui %189 : i1 to i32
    %c0_i32_74 = arith.constant 0 : i32
    %191 = arith.cmpi ne, %190, %c0_i32_74 : i32
    scf.if %191 {
      %c0_75 = arith.constant 0 : index
      %c0_76 = arith.constant 0 : index
      %192 = vector.load %arg13[%c0_75, %c0_76] : memref<1x128xf32, #tpu.memory_space<vmem>>, vector<1x128xf32>
      %c0_77 = arith.constant 0 : index
      %c0_78 = arith.constant 0 : index
      %193 = vector.load %arg14[%c0_77, %c0_78] : memref<1x128xf32, #tpu.memory_space<vmem>>, vector<1x128xf32>
      %cst_79 = arith.constant dense<0.000000e+00> : vector<16xf32>
      %194 = vector.multi_reduction <add>, %187, %cst_79 [1] : vector<16x128xf32> to vector<16xf32>
      %195 = vector.shape_cast %194 : vector<16xf32> to vector<16x1xf32>
      %cst_80 = arith.constant 3.125000e-02 : f32
      %196 = vector.broadcast %cst_80 : f32 to vector<16x1xf32>
      %197 = arith.mulf %195, %196 : vector<16x1xf32>
      %198 = vector.broadcast %197 : vector<16x1xf32> to vector<16x128xf32>
      %199 = arith.subf %187, %198 : vector<16x128xf32>
      %200 = vector.broadcast %7 : vector<1x128xf32> to vector<16x128xf32>
      %201 = arith.mulf %199, %200 : vector<16x128xf32>
      %202 = arith.mulf %201, %201 : vector<16x128xf32>
      %cst_81 = arith.constant dense<0.000000e+00> : vector<16xf32>
      %203 = vector.multi_reduction <add>, %202, %cst_81 [1] : vector<16x128xf32> to vector<16xf32>
      %204 = vector.shape_cast %203 : vector<16xf32> to vector<16x1xf32>
      %cst_82 = arith.constant 3.125000e-02 : f32
      %205 = vector.broadcast %cst_82 : f32 to vector<16x1xf32>
      %206 = arith.mulf %204, %205 : vector<16x1xf32>
      %cst_83 = arith.constant 9.99999974E-6 : f32
      %207 = vector.broadcast %cst_83 : f32 to vector<16x1xf32>
      %208 = arith.addf %206, %207 : vector<16x1xf32>
      %209 = math.rsqrt %208 : vector<16x1xf32>
      %210 = vector.broadcast %209 : vector<16x1xf32> to vector<16x128xf32>
      %211 = arith.mulf %199, %210 : vector<16x128xf32>
      %212 = vector.broadcast %192 : vector<1x128xf32> to vector<16x128xf32>
      %213 = arith.mulf %211, %212 : vector<16x128xf32>
      %214 = vector.broadcast %193 : vector<1x128xf32> to vector<16x128xf32>
      %215 = arith.addf %213, %214 : vector<16x128xf32>
      %c0_84 = arith.constant 0 : index
      %c0_85 = arith.constant 0 : index
      %216 = vector.load %arg15[%c0_84, %c0_85] : memref<16x128xf32, #tpu.memory_space<vmem>>, vector<16x128xf32>
      tpu.vector_store %arg15[%c0_84, %c0_85], %215 {strides = array<i32>} : memref<16x128xf32, #tpu.memory_space<vmem>>, vector<16x128xf32>,
    } else {
    }
    return
  }
  func.func @transform_0(%arg0: i32) -> (i32, i32) {
    %c0_i32 = arith.constant 0 : i32
    %c0_i32_0 = arith.constant 0 : i32
    %c0_i32_1 = arith.constant 0 : i32
    return %c0_i32, %c0_i32_0 : i32, i32
  }
  func.func @transform_1(%arg0: i32) -> (i32, i32, i32) {
    %c0_i32 = arith.constant 0 : i32
    %c0_i32_0 = arith.constant 0 : i32
    %c0_i32_1 = arith.constant 0 : i32
    return %arg0, %c0_i32, %c0_i32_0 : i32, i32, i32
  }
  func.func @transform_2(%arg0: i32) -> (i32, i32, i32) {
    %c0_i32 = arith.constant 0 : i32
    %c0_i32_0 = arith.constant 0 : i32
    %c0_i32_1 = arith.constant 0 : i32
    return %arg0, %c0_i32, %c0_i32_0 : i32, i32, i32
  }
  func.func @transform_3(%arg0: i32) -> (i32, i32, i32) {
    %c0_i32 = arith.constant 0 : i32
    %c0_i32_0 = arith.constant 0 : i32
    %c0_i32_1 = arith.constant 0 : i32
    return %arg0, %c0_i32, %c0_i32_0 : i32, i32, i32
  }
  func.func @transform_4(%arg0: i32) -> (i32, i32, i32, i32) {
    %c0_i32 = arith.constant 0 : i32
    %c0_i32_0 = arith.constant 0 : i32
    %c0_i32_1 = arith.constant 0 : i32
    %c0_i32_2 = arith.constant 0 : i32
    return %arg0, %c0_i32, %c0_i32_0, %c0_i32_1 : i32, i32, i32, i32
  }
  func.func @transform_5(%arg0: i32) -> (i32, i32, i32) {
    %c0_i32 = arith.constant 0 : i32
    %c0_i32_0 = arith.constant 0 : i32
    %c0_i32_1 = arith.constant 0 : i32
    return %arg0, %c0_i32, %c0_i32_0 : i32, i32, i32
  }
  func.func @transform_6(%arg0: i32) -> (i32, i32, i32) {
    %c0_i32 = arith.constant 0 : i32
    %c0_i32_0 = arith.constant 0 : i32
    %c0_i32_1 = arith.constant 0 : i32
    return %arg0, %c0_i32, %c0_i32_0 : i32, i32, i32
  }
  func.func @transform_7(%arg0: i32) -> (i32, i32, i32) {
    %c0_i32 = arith.constant 0 : i32
    %c0_i32_0 = arith.constant 0 : i32
    %c0_i32_1 = arith.constant 0 : i32
    return %arg0, %c0_i32, %c0_i32_0 : i32, i32, i32
  }
  func.func @transform_8(%arg0: i32) -> (i32, i32, i32) {
    %c0_i32 = arith.constant 0 : i32
    %c0_i32_0 = arith.constant 0 : i32
    %c0_i32_1 = arith.constant 0 : i32
    return %arg0, %c0_i32, %c0_i32_0 : i32, i32, i32
  }
  func.func @transform_9(%arg0: i32) -> (i32, i32, i32) {
    %c0_i32 = arith.constant 0 : i32
    %c0_i32_0 = arith.constant 0 : i32
    %c0_i32_1 = arith.constant 0 : i32
    return %arg0, %c0_i32, %c0_i32_0 : i32, i32, i32
  }
  func.func @transform_10(%arg0: i32) -> (i32, i32, i32) {
    %c0_i32 = arith.constant 0 : i32
    %c0_i32_0 = arith.constant 0 : i32
    %c0_i32_1 = arith.constant 0 : i32
    return %arg0, %c0_i32, %c0_i32_0 : i32, i32, i32
  }
  func.func @transform_11(%arg0: i32) -> (i32, i32, i32) {
    %c0_i32 = arith.constant 0 : i32
    %c0_i32_0 = arith.constant 0 : i32
    %c0_i32_1 = arith.constant 0 : i32
    return %arg0, %c0_i32, %c0_i32_0 : i32, i32, i32
  }
  func.func @transform_12(%arg0: i32) -> (i32, i32) {
    %c0_i32 = arith.constant 0 : i32
    %c0_i32_0 = arith.constant 0 : i32
    %c0_i32_1 = arith.constant 0 : i32
    return %c0_i32, %c0_i32_0 : i32, i32
  }
  func.func @transform_13(%arg0: i32) -> (i32, i32) {
    %c0_i32 = arith.constant 0 : i32
    %c0_i32_0 = arith.constant 0 : i32
    %c0_i32_1 = arith.constant 0 : i32
    return %c0_i32, %c0_i32_0 : i32, i32
  }
  func.func @transform_14(%arg0: i32) -> (i32, i32) {
    %c0_i32 = arith.constant 0 : i32
    %c0_i32_0 = arith.constant 0 : i32
    %c0_i32_1 = arith.constant 0 : i32
    return %c0_i32, %c0_i32_0 : i32, i32
  }
}

</mosaic_0001>

<bundles_post_ra>
// kernel: transformer_forward.1
= control target key start
LH: loop header
LB: loop body
LE: loop exit
PB: predicated region body
PF: predicated region fallthrough
CT: control target
= control target key end

     0   :  { %s2979_s0 = inlined_call_operand.vmem [shape: f32[16,128], index: 0, kind: input, shape index: {}]   ;;  %s2980_s1 = inlined_call_operand.vmem [shape: f32[2,1,128], index: 1, kind: input, shape index: {}]   ;;  %s2981_s2 = inlined_call_operand.vmem [shape: f32[2,1,128], index: 2, kind: input, shape index: {}]   ;;  %s2982_s3 = inlined_call_operand.vmem [shape: bf16[2,32,96], index: 3, kind: input, shape index: {}]   ;;  %s2983_s4 = inlined_call_operand.hbm [shape: bf16[2,4,8,128], index: 4, kind: input, shape index: {}]   ;;  %s2984_s5 = inlined_call_operand.vmem [shape: f32[2,1,128], index: 5, kind: input, shape index: {}]   ;;  %s2985_s6 = inlined_call_operand.vmem [shape: f32[2,1,128], index: 6, kind: input, shape index: {}]   ;;  %s2986_s7 = inlined_call_operand.vmem [shape: f32[2,1,128], index: 7, kind: input, shape index: {}]   ;;  %s2987_s8 = inlined_call_operand.hbm [shape: bf16[2,32,64], index: 8, kind: input, shape index: {}]   ;;  %s2988_s9 = inlined_call_operand.hbm [shape: f32[2,1,64], index: 9, kind: input, shape index: {}]   ;;  %s2989_s10 = inlined_call_operand.vmem [shape: bf16[2,64,128], index: 10, kind: input, shape index: {}]   ;;  %s2990_s11 = inlined_call_operand.vmem [shape: f32[2,1,128], index: 11, kind: input, shape index: {}]   ;;  %s2991_s12 = inlined_call_operand.vmem [shape: f32[1,128], index: 12, kind: input, shape index: {}]   ;;  %s2992_s13 = inlined_call_operand.vmem [shape: f32[1,128], index: 13, kind: input, shape index: {}]   ;;  %s2993_s14 = inlined_call_operand.vmem [shape: f32[16,128], index: 14, kind: output, shape index: {}]  }
   0x1   :  { %3005 = sst [smem:[#allocation13_spill]] %s2979_s0 }
   0x2   :  { %3006 = sst [smem:[#allocation14_spill]] %s2983_s4 }
   0x3   :  { %3007 = sst [smem:[#allocation15_spill]] %s2987_s8 }
   0x4   :  { %3008 = sst [smem:[#allocation16_spill]] %s2988_s9 }
   0x5   :  { %3009 = sst [smem:[#allocation17_spill]] %s2991_s12 }
   0x6   :  { %3010 = sst [smem:[#allocation18_spill]] %s2992_s13 }
   0x7   :  { %3011 = sst [smem:[#allocation19_spill]] %s2993_s14 }
   0x8   :  { %19 = vsyncpa [#allocation4], 0 }
   0x9   :  { %21 = vsyncpa [#allocation4 + $0x1], 0 }
   0xa   :  { %22 = vsyncpa [#allocation6], 0 }
   0xb   :  { %24 = vsyncpa [#allocation6 + $0x1], 0  ;;  %s2525_s29 = smov 0   ;;  %s2527_s30 = smov 0  }
   0xc   :  { %s2529_s15 = smov 0   ;;  %s2531_s16 = smov 0  }
   0xd LB: > { %3012 = sst [smem:[#allocation10_spill]] %s2431_s15  ;;  %s2544_s17 = sadd.s32 4294967295, %s2435_s16   ;;  %s2435_s16 = sphi %s2531_s16, %s3039_s16   ;;  %s2431_s15 = sphi %s2529_s15, %s3041_s15   ;;  %s2427_s30 = sphi %s2527_s30, %s3043_s30   ;;  %s2423_s29 = sphi %s2525_s29, %s3042_s29  }
   0xe   : > { %s2547_s18 = sadd.s32 1, %s2435_s16   ;;  %s136_s20 = sadd.s32 1, %s2431_s15 }
   0xf   : > { %3013 = sst [smem:[#allocation11_spill]] %s2547_s18  ;;  %s133_s19 = ssub.s32 %s2435_s16, %s2547_s18 }
  0x10   : > { %p134_p0 = scmp.eq.s32.totalorder %s133_s19, 0  ;;  %p143_p1 = scmp.ne.s32.totalorder %s2431_s15, %s2427_s30 }
  0x11   : > { %p144_p2 = scmp.eq.s32.totalorder %s2435_s16, 0  ;;  %p149_p3 = scmp.ne.s32.totalorder %s2427_s30, %s2423_s29 }
  0x12   : > { %s2557_s21 = scalar_select %p134_p0, %s2431_s15, %s136_s20  }
  0x13   : > { %p145_p4 = por %p144_p2, %p143_p1  ;;  %p150_p5 = scmp.eq.s32.totalorder %s2544_s17, 0 }
  0x14   : > { %3014 = sst [smem:[#allocation12_spill]] %s2557_s21  ;;  %p2189_p6 = scmp.lt.s32.totalorder %s2435_s16, 2 }
  0x15   : > { %p2561_p7 = por %p150_p5, %p149_p3  ;;  %s2566_s23 = sand.u32 1, %s2431_s15  }
  0x16   : > { %s2997_s24 = sshll.u32 %s2566_s23, 4  ;;  %s2998_s25 = sshll.u32 %s2435_s16, 8 }
  0x17   : > { %s3015_s22 = scalar_select %p2561_p7, 1, 0 }
  0x18   : > { %p2570_p8 = pnand %p2189_p6, %p145_p4  ;;  %s486_s27 = sand.u32 1, %s2435_s16  }
  0x19   : > { %s3017_s8 = sld [smem:[#allocation15_spill]]  ;;  %s490_s20 = scalar_lea.vmem [#allocation5], %s2997_s24 }
  0x1a   : > { %s3016_s26 = scalar_select %p2570_p8, 1, 0 }
  0x1b   : > { %s497_s21 = sshll.u32 %s490_s20, 4  ;;  %s2588_s15 = scalar_lea.sflag [#allocation6], %s486_s27  ;;  %s2585_s21 = int_to_ptr.vmem [resolvable:$true] %s497_s21 }
  0x1c   : > { %p2594_p12 = pneg %p2570_p8 }
  0x1f   : > { %s2580_s19 = scalar_lea.hbm %s3017_s8, %s2998_s25  ;;  %s2312_s20 = scalar_lea.hbm %s3017_s8, 512 }
  0x20   : > { %s2307_s18 = scalar_lea.hbm %s2580_s19, 256  ;;  %p2313_p1 = scmp.lt.u32.totalorder %s2580_s19, %s3017_s8 }
  0x21   : > { %p2308_p11 = scmp.ne.s32.totalorder %s2580_s19, %s2307_s18  ;;  %p2314_p2 = scmp.lt.u32.totalorder %s2312_s20, %s2307_s18 }
  0x22   : > { %p2316_p4 = scmp.lt.u32.totalorder %s2307_s18, %s2580_s19 }
  0x23   : > { %p2310_p13 = pnand %p2594_p12, %p2308_p11  ;;  %p2315_p3 = por %p2314_p2, %p2313_p1 }
  0x25   : > { %p2311_p0 = pneg %p2310_p13  ;;  %p2317_p5 = por %p2316_p4, %p2315_p3 }
  0x27   : > { %p2318_p6 = pnand %p2317_p5, %p2311_p0 }
  0x29   : > { %2321 = shalt.err (!%p2318_p6)
}
  0x2a   : > { %s2322_s27 = scalar_lea.vmem %s2585_s21, 256  ;;  %s2437_s24 = smov [#allocation5]  }
  0x2b   : > { %p2323_p11 = scmp.ne.s32.totalorder %s2585_s21, %s2322_s27  ;;  %s2327_s29 = sshll.u32 %s2437_s24, 4  ;;  %s2328_s29 = int_to_ptr.vmem [resolvable:$false] %s2327_s29 }
  0x2c   : > { %s2329_s14 = scalar_lea.vmem %s2328_s29, 512  ;;  %p2330_p10 = scmp.lt.s32.totalorder %s2585_s21, %s2328_s29 }
  0x2d   : > { %p2325_p13 = pnand %p2323_p11, %p2594_p12  ;;  %p2331_p7 = scmp.lt.s32.totalorder %s2329_s14, %s2322_s27 }
  0x2f   : > { %p2326_p9 = pneg %p2325_p13  ;;  %p2332_p1 = por %p2331_p7, %p2330_p10 }
  0x31   : > { %p2333_p2 = pnand %p2332_p1, %p2326_p9 }
  0x33   : > { %2336 = shalt.err (!%p2333_p2)
}
  0x34   : > { %s3001_s18 = smov 64   ;;  %s3002_s25 = smov 4  }
  0x35   : > { %2185 = dma.hbm_to_vmem [thread:$0]  (!%p2570_p8), %s2580_s19, 256, %s2585_s21, %s2588_s15, %s3001_s18, %s3001_s18, %s3002_s25  }
  0x36   : > { %p3019_p7 = scmp.lt.s32.totalorder %s2435_s16, 3  ;;  %p3020_p9 = scmp.ge.s32.totalorder %s2435_s16, 1 }
  0x37   : > { %s3022_s27 = sshll.u32 %s2435_s16, 8  ;;  %s3023_s4 = sld [smem:[#allocation14_spill]] }
  0x38   : > { %p2625_p10 = pnand %p3020_p9, %p3019_p7  ;;  %s3024_s8 = sshll.u32 %s2566_s23, 4 }
  0x39   : > { %s451_s13 = scalar_lea.vmem [#allocation3], %s3024_s8  ;;  %s1985_s21 = sshll.u32 %s2435_s16, 4 }
  0x3a   : > { %s3021_s20 = scalar_select %p2625_p10, 1, 0 }
  0x3b   : > { %s458_s12 = sshll.u32 %s451_s13, 4  ;;  %s448_s19 = scalar_lea.sflag [#allocation4], %s2566_s23  ;;  %s2638_s12 = int_to_ptr.vmem [resolvable:$true] %s458_s12 }
  0x3d   : > { %s2634_s14 = scalar_lea.hbm %s3023_s4, %s3022_s27  ;;  %s2342_s27 = scalar_lea.hbm %s3023_s4, 512 }
  0x3e   : > { %s2337_s18 = scalar_lea.hbm %s2634_s14, 256  ;;  %p2343_p5 = scmp.lt.u32.totalorder %s2634_s14, %s3023_s4 }
  0x3f   : > { %p2338_p0 = scmp.ne.s32.totalorder %s2634_s14, %s2337_s18  ;;  %p2344_p6 = scmp.lt.u32.totalorder %s2342_s27, %s2337_s18 }
  0x40   : > { %p2346_p13 = scmp.lt.u32.totalorder %s2337_s18, %s2634_s14 }
  0x41   : > { %p2340_p3 = pnand %p2338_p0, %p2594_p12  ;;  %p2345_p11 = por %p2344_p6, %p2343_p5 }
  0x43   : > { %p2341_p4 = pneg %p2340_p3  ;;  %p2347_p1 = por %p2346_p13, %p2345_p11 }
  0x45   : > { %p2348_p2 = pnand %p2347_p1, %p2341_p4 }
  0x47   : > { %2351 = shalt.err (!%p2348_p2)
}
  0x48   : > { %s2352_s8 = scalar_lea.vmem %s2638_s12, 256  ;;  %s2440_s13 = smov [#allocation3]  }
  0x49   : > { %p2353_p7 = scmp.ne.s32.totalorder %s2638_s12, %s2352_s8  ;;  %s2357_s25 = sshll.u32 %s2440_s13, 4  ;;  %s2358_s25 = int_to_ptr.vmem [resolvable:$false] %s2357_s25 }
  0x4a   : > { %s2359_s0 = scalar_lea.vmem %s2358_s25, 512  ;;  %p2360_p3 = scmp.lt.s32.totalorder %s2638_s12, %s2358_s25 }
  0x4b   : > { %p2355_p9 = pnand %p2353_p7, %p2594_p12  ;;  %p2361_p10 = scmp.lt.s32.totalorder %s2359_s0, %s2352_s8 }
  0x4d   : > { %p2356_p0 = pneg %p2355_p9  ;;  %p2362_p5 = por %p2361_p10, %p2360_p3 }
  0x4f   : > { %p2363_p6 = pnand %p2362_p5, %p2356_p0 }
  0x51   : > { %2366 = shalt.err (!%p2363_p6)
}
  0x52   : > { %s3025_s18 = smov 4   ;;  %s3026_s24 = smov 64  }
  0x53   : > { %2182 = dma.hbm_to_vmem [thread:$0]  (!%p2570_p8), %s2634_s14, 256, %s2638_s12, %s448_s19, %s3026_s24, %s3026_s24, %s3025_s18  }
  0x54   : > { %s3027_s9 = sld [smem:[#allocation16_spill]]  ;;  %s510_s13 = scalar_lea.vmem [#allocation7], %s2566_s23 }
  0x55   : > { %s517_s25 = sshll.u32 %s510_s13, 4  ;;  %s518_s25 = int_to_ptr.vmem [resolvable:$true] %s517_s25 }
  0x5a   : > { %s2673_s8 = scalar_lea.hbm %s3027_s9, %s1985_s21  ;;  %s2372_s16 = scalar_lea.hbm %s3027_s9, 32 }
  0x5b   : > { %s2367_s0 = scalar_lea.hbm %s2673_s8, 16  ;;  %p2373_p13 = scmp.lt.u32.totalorder %s2673_s8, %s3027_s9 }
  0x5c   : > { %p2368_p10 = scmp.ne.s32.totalorder %s2673_s8, %s2367_s0  ;;  %p2374_p1 = scmp.lt.u32.totalorder %s2372_s16, %s2367_s0 }
  0x5d   : > { %p2376_p7 = scmp.lt.u32.totalorder %s2367_s0, %s2673_s8 }
  0x5e   : > { %p2370_p4 = pnand %p2368_p10, %p2594_p12  ;;  %p2375_p2 = por %p2374_p1, %p2373_p13 }
  0x60   : > { %p2371_p11 = pneg %p2370_p4  ;;  %p2377_p9 = por %p2376_p7, %p2375_p2 }
  0x62   : > { %p2378_p0 = pnand %p2377_p9, %p2371_p11 }
  0x64   : > { %2381 = shalt.err (!%p2378_p0)
}
  0x65   : > { %s2382_s23 = scalar_lea.vmem %s518_s25, 16  ;;  %s2441_s21 = smov [#allocation7]  }
  0x66   : > { %p2383_p3 = scmp.ne.s32.totalorder %s518_s25, %s2382_s23  ;;  %s2387_s18 = sshll.u32 %s2441_s21, 4  ;;  %s2388_s18 = int_to_ptr.vmem [resolvable:$false] %s2387_s18 }
  0x67   : > { %s2389_s4 = scalar_lea.vmem %s2388_s18, 32  ;;  %p2390_p10 = scmp.lt.s32.totalorder %s518_s25, %s2388_s18 }
  0x68   : > { %p2385_p5 = pnand %p2383_p3, %p2594_p12  ;;  %p2391_p4 = scmp.lt.s32.totalorder %s2389_s4, %s2382_s23 }
  0x6a   : > { %p2386_p6 = pneg %p2385_p5  ;;  %p2392_p8 = por %p2391_p4, %p2390_p10 }
  0x6c   : > { %p2393_p1 = pnand %p2392_p8, %p2386_p6 }
  0x6e   : > { %2396 = shalt.err (!%p2393_p1)
}
  0x6f   : > { %p3028_p13 = scmp.ne.s32.totalorder %s3016_s26, 0  ;;  %p3029_p11 = scmp.ne.s32.totalorder %s3021_s20, 0 }
  0x70   : > { %s2697_s28 = sand.u32 (!%p3029_p11), 1, %s2427_s30   ;;  %p3030_p8 = scmp.ne.s32.totalorder (!%p3029_p11), %s3015_s22, 0 }
  0x71   : > { %2188 = dma.hbm_to_vmem [thread:$0]  (!%p3028_p13), %s2673_s8, 16, %s518_s25, %s2588_s15  }
  0x72   : > { %540 = sbr.rel (%p3029_p11) target bundleno = 3015 (0xbc7), region = 76  ;;  %s1987_s24 = sshll.u32 (!%p3029_p11), %s2697_s28, 4 }
  0x73   : > { %s543_s27 = scalar_lea.sflag (!%p3029_p11), [#allocation4], %s2697_s28  ;;  %s2701_s29 = scalar_lea.vmem (!%p3029_p11), [#allocation3], %s1987_s24 }
  0x79   : > { %2414 = dma.done.wait (%p3030_p8), %s543_s27, 256  }
  0x7a   : > { %2416 = vsyncadd (%p3030_p8), %s543_s27, 4294967040  ;;  %s551_s15 = sand.u32 1, %s2544_s17   ;;  %s2708_s20 = scalar_lea.vmem [#allocation5], %s1987_s24 }
  0x7b   : > { %s552_s26 = scalar_lea.sflag [#allocation6], %s551_s15 }
  0x7c   : > { %2418 = dma.done.wait (%p3030_p8), %s552_s26, 272  }
  0x7d   : > { %2420 = vsyncadd (%p3030_p8), %s552_s26, 4294967024  ;;  %p640_p12 = scmp.lt.s32.totalorder %s2544_s17, 1  ;;  %p1993_p2 = scmp.ne.s32.totalorder %s2544_s17, 0 }
  0x7e   : > { %s3031_s15 = sld [smem:[#allocation13_spill]] (!%p1993_p2) }
  0x7f   : > { %s2716_s8 = scalar_select %p640_p12, %s2544_s17, 1 }
  0x80   : > { %672 = sbr.rel (%p1993_p2) target bundleno = 136 (0x88), region = 92 }
  0x81   : > { %s2036_s14 = sshll.u32 %s2716_s8, 4  ;;  %s653_s21 = scalar_lea.vmem %s2984_s5, %s2716_s8 }
  0x82   : > { %s2734_s24 = scalar_lea.vmem %s2982_s3, %s2036_s14  ;;  %s659_s0 = scalar_lea.vmem %s2986_s7, %s2716_s8 }
  0x83   : > { %s2037_s22 = sshll.u32 %s2716_s8, 5  ;;  %s667_s18 = scalar_lea.vmem %s2990_s11, %s2716_s8 }
  0x84   : > { %s2748_s9 = scalar_lea.vmem %s2989_s10, %s2037_s22  ;;  %s563_s14 = scalar_lea.vmem [#allocation7], %s2697_s28  ;;  %v673_v0 = vld [vmem:[%s3031_s15] sm:$0xff] (!%p1993_p2) }
  0x85   : > { %s3032_s26 = smov (!%p1993_p2), %s3031_s15  ;;  %675 = vst [vmem:[#allocation2] sm:$0xff] (!%p1993_p2), %v673_v0 }
  0x86   : > { %v674_v1 = vld [vmem:[%s3032_s26 + $0x8] sm:$0xff] (!%p1993_p2) }
  0x87   : > { %676 = vst [vmem:[#allocation2 + $0x8] sm:$0xff] %v674_v1 }
  0x88 PF: > { %v2442_v4 = vmov 0.0   ;;  %v677_v5 = vlaneseq  ;;  %v2247_v18 = vld [vmem:[%s2734_s24] sm:$0xff]   ;;  %v2248_v19 = vld [vmem:[%s2734_s24 + $0x8] sm:$0xff]   ;;  %vm2443_vm1 = vmmov 0   ;;  %s3033_s22 = scalar_lea.vmem %s2980_s1, %s2716_s8  ;;  %s3034_s23 = scalar_lea.vmem %s2981_s2, %s2716_s8  ;;  %vm753_vm2 = vcmask 261120  }
  0x89   : > { %2073 = vmatprep.subr.bf16.mxu1 %v2442_v4  ;;  %2087 = vmatprep.subr.bf16.mxu0 %v2442_v4  ;;  %v1995_v28 = vld [vmem:[%s3033_s22] ss:$0 sm:$0xff]  ;;  %s2444_s4 = smov 112   ;;  %s2445_s27 = smov 120   ;;  %vm825_vm3 = vcmask 64512   ;;  %vm1023_vm6 = vcmask 130048  }
  0x8a   : > { %v2771_v6 = vand.u32 127, %v677_v5  ;;  %2074 = vmatpush3.bf16.msra.mxu1 %v2247_v18  ;;  %2077 = vmatprep.mubr.msk.bf16.mxu1 %vm2443_vm1, %v2442_v4  ;;  %v1996_v32 = vld [vmem:[%s3034_s23] ss:$0 sm:$0xff]  ;;  %s2446_s15 = smov 104   ;;  %s2447_s13 = smov 96   ;;  %v683_v63 = vshrl.u32 %v677_v5, 7 }
  0x8b   : > { %2075 = vmatprep.subr.bf16.mxu1 %v2442_v4  ;;  %2089 = vmatprep.mubr.msk.bf16.mxu0 %vm2443_vm1, %v2442_v4  ;;  %s2449_s25 = smov 64   ;;  %vm1315_vm7 = vcmask 1043456   ;;  %s3035_s22 = scalar_lea.vmem %s2985_s6, %s2716_s8  ;;  %vm1722_vm10 = vcmask 523264  }
  0x8c   : > { %vm679_vm0 = vcmp.lt.s32.totalorder %v2771_v6, 32  ;;  %v684_v0 = vadd.s32 8, %v683_v63  ;;  %v685_v1 = vshra.s32 %v683_v63, 3  ;;  %p2029_p7 = scmp.ne.s32.totalorder %s2544_s17, 1 }
  0x8d   : > { %v2762_v2 = vld [vmem:[#allocation2] sm:$0xff]  ;;  %v2775_v9 = vsel %vm679_vm0, 1.0, %v2442_v4  ;;  %s3037_s19 = sld [smem:[#allocation18_spill]] (!%p2029_p7) }
  0x8e   : > { %v2764_v3 = vld [vmem:[#allocation2 + $0x8] sm:$0xff]  ;;  %696 = vadd.xlane.f32.xlu0 %v2762_v2  ;;  %2076 = vmatpush3.bf16.msra.mxu1 %v2248_v19 }
  0x8f   : > { %2081 = vmatprep.subr.bf16.mxu1 %v2442_v4 }
  0x92   : > { %698 = vadd.xlane.f32.xlu0 %v2764_v3 }
 0x11b   : > { %v697_v7 = vpop.xlane.xlu0 %696 }
 0x11c   : > { %v700_v8 = vmul.f32 0.03125, %v697_v7  ;;  %v687_v7 = vshra.s32 %v2771_v6, 3 }
 0x11e   : > { %v702_v10 = vsub.f32 %v2762_v2, %v700_v8  ;;  %v686_v8 = vshra.s32 %v684_v0, 3  ;;  %vm688_vm4 = vcmp.eq.s32.totalorder %v685_v1, %v687_v7 }
 0x11f   : > { %v699_v11 = vpop.xlane.xlu0 %698 }
 0x120   : > { %v701_v12 = vmul.f32 0.03125, %v699_v11  ;;  %v704_v13 = vmul.f32 %v2775_v9, %v702_v10  ;;  %vm689_vm5 = vcmp.eq.s32.totalorder %v686_v8, %v687_v7 }
 0x122   : > { %v703_v14 = vsub.f32 %v2764_v3, %v701_v12  ;;  %v706_v15 = vmul.f32 %v704_v13, %v704_v13 }
 0x124   : > { %708 = vadd.xlane.f32.xlu1 %v706_v15  ;;  %v705_v16 = vmul.f32 %v2775_v9, %v703_v14 }
 0x126   : > { %v707_v17 = vmul.f32 %v705_v16, %v705_v16 }
 0x128   : > { %710 = vadd.xlane.f32.xlu1 %v707_v17 }
 0x1b1   : > { %v709_v20 = vpop.xlane.xlu1 %708 }
 0x1b2   : > { %v712_v21 = vmul.f32 0.03125, %v709_v20 }
 0x1b4   : > { %v714_v22 = vadd.f32 1e-05, %v712_v21 }
 0x1b5   : > { %v711_v23 = vpop.xlane.xlu1 %710 }
 0x1b6   : > { %2255 = vrsqrt.f32 %v714_v22  ;;  %v713_v24 = vmul.f32 0.03125, %v711_v23 }
 0x1b8   : > { %v715_v25 = vadd.f32 1e-05, %v713_v24 }
 0x1ba   : > { %2257 = vrsqrt.f32 %v715_v25 }
 0x1c0   : > { %v2256_v26 = vpop.eup %2255 }
 0x1c1   : > { %v718_v27 = vmul.f32 %v2256_v26, %v702_v10  ;;  %v2448_v10 = vmov -1e+30  }
 0x1c2   : > { %v690_v11 = vsel %vm688_vm4, 0.0, %v2448_v10  ;;  %v691_v13 = vsel %vm689_vm5, 0.0, %v2448_v10 }
 0x1c3   : > { %v726_v31 = vmul.f32 %v1995_v28, %v718_v27 }
 0x1c4   : > { %v2258_v29 = vpop.eup %2257 }
 0x1c5   : > { %v719_v30 = vmul.f32 %v2258_v29, %v703_v14  ;;  %v734_v34 = vadd.f32 %v1996_v32, %v726_v31 }
 0x1c7   : > { %v727_v33 = vmul.f32 %v1995_v28, %v719_v30 }
 0x1c9   : > { %v735_v35 = vadd.f32 %v1996_v32, %v727_v33 }
 0x1cb   : > { %v736_v36 = vpack.c.bf16 %v735_v35, %v734_v34 }
 0x1cd   : > { %2078 = vmatmul.mubr.msk.bf16.vlgmr.msra.gmra.mrb[0].mxu1 %vm753_vm2, %v736_v36 }
 0x1ce   : > { %2083 = vmatprep.mubr.msk.bf16.mxu1 %vm2443_vm1, %v2442_v4 }
 0x2a0   : > { %v791_v37 = vpop.f32.mrb[0].mxu1 }
 0x2a1   : > { %v2079_v38 = vpop.f32.mrb[1].mxu1 }
 0x2a2   : > { %v794_v39 = vpop.f32.mrb[2].mxu1 }
 0x2a3   : > { %v2080_v40 = vpop.f32.mrb[3].mxu1  ;;  %v2237_v41 = vpack.i.bf16 %v794_v39, %v791_v37  ;;  %v2802_v42 = vpack.c.bf16 %v794_v39, %v791_v37 }
 0x2a5   : > { %2238 = vrot.lane.b32.xlu1 %v2237_v41, %s2444_s4  ;;  %2233 = vrot.lane.b32.xlu0 %v2237_v41, %s2445_s27  ;;  %s3038_s27 = sld [smem:[#allocation19_spill]] (!%p2029_p7) }
 0x2a9   : > { %2243 = vrot.lane.b32.xlu1 %v2237_v41, %s2446_s15 }
 0x2ad   : > { %823 = vrot.lane.b32.xlu1 %v2802_v42, %s2447_s13 }
 0x317   : > { %v2239_v43 = vpop.permute.xlu1 %2238  ;;  %v2234_v44 = vpop.permute.xlu0 %2233 }
 0x318   : > { %v2241_v45 = vunpack.i.h.bf16 %v2239_v43  ;;  %v2240_v46 = vunpack.i.l.bf16 %v2239_v43  ;;  %v2236_v47 = vunpack.i.h.bf16 %v2234_v44  ;;  %v2235_v48 = vunpack.i.l.bf16 %v2234_v44 }
 0x31a   : > { %v2805_v49 = vpack.c.bf16 %v2241_v45, %v2240_v46  ;;  %v2807_v50 = vpack.c.bf16 %v2236_v47, %v2235_v48 }
 0x31b   : > { %v2244_v51 = vpop.permute.xlu1 %2243 }
 0x31c   : > { %v2246_v52 = vunpack.i.h.bf16 %v2244_v51  ;;  %v2245_v53 = vunpack.i.l.bf16 %v2244_v51  ;;  %874 = vrot.lane.b32.xlu0 %v2807_v50, %s2447_s13  ;;  %924 = vrot.lane.b32.xlu1 %v2805_v49, %s2447_s13 }
 0x31e   : > { %v2811_v54 = vpack.c.bf16 %v2246_v52, %v2245_v53 }
 0x31f   : > { %v824_v55 = vpop.permute.xlu1 %823 }
 0x320   : > { %v830_v56 = vsel %vm825_vm3, %v824_v55, 0  ;;  %974 = vrot.lane.b32.xlu0 %v2811_v54, %s2447_s13 }
 0x321   : > { %2082 = vmatpush3.bf16.xpose.msra.mxu1 %v830_v56 }
 0x322   : > { %2093 = vmatprep.subr.bf16.mxu1 %v2442_v4 }
 0x328   : > { %2084 = vmatmul.mubr.msk.bf16.vlgmr.msra.gmra.mrb[4].mxu1 %vm825_vm3, %v2802_v42 }
 0x329   : > { %2095 = vmatprep.mubr.msk.bf16.mxu1 %vm2443_vm1, %v2442_v4 }
 0x38e   : > { %v875_v57 = vpop.permute.xlu0 %874  ;;  %v925_v58 = vpop.permute.xlu1 %924 }
 0x38f   : > { %v930_v59 = vsel %vm825_vm3, %v925_v58, 0  ;;  %v880_v60 = vsel %vm825_vm3, %v875_v57, 0 }
 0x390   : > { %2088 = vmatpush3.bf16.xpose.msra.mxu0 %v880_v60  ;;  %2094 = vmatpush3.bf16.xpose.msra.mxu1 %v930_v59 }
 0x391   : > { %2099 = vmatprep.subr.bf16.mxu0 %v2442_v4  ;;  %2105 = vmatprep.subr.bf16.mxu1 %v2442_v4 }
 0x392   : > { %v975_v61 = vpop.permute.xlu0 %974 }
 0x393   : > { %v980_v62 = vsel %vm825_vm3, %v975_v61, 0 }
 0x397   : > { %2090 = vmatmul.mubr.msk.bf16.vlgmr.msra.gmra.mrb[0].mxu0 %vm825_vm3, %v2807_v50  ;;  %2096 = vmatmul.mubr.msk.bf16.vlgmr.msra.gmra.mrb[8].mxu1 %vm825_vm3, %v2805_v49 }
 0x398   : > { %2100 = vmatpush3.bf16.xpose.msra.mxu0 %v980_v62  ;;  %2101 = vmatprep.mubr.msk.bf16.mxu0 %vm2443_vm1, %v2442_v4 }
 0x399   : > { %2107 = vmatprep.mubr.msk.bf16.mxu1 %vm2443_vm1, %v2442_v4  ;;  %2111 = vmatprep.subr.bf16.mxu0 %v2442_v4 }
 0x39f   : > { %2102 = vmatmul.mubr.msk.bf16.vlgmr.msra.gmra.mrb[4].mxu0 %vm825_vm3, %v2811_v54 }
 0x3a0   : > { %2113 = vmatprep.mubr.msk.bf16.mxu0 %vm2443_vm1, %v2442_v4 }
 0x3fb   : > { %v866_v12 = vpop.f32.mrb[4].mxu1 }
 0x3fc   : > { %v867_v14 = vadd.f32 %v866_v12, %v690_v11  ;;  %v2085_v15 = vpop.f32.mrb[5].mxu1 }
 0x3fd   : > { %v869_v16 = vpop.f32.mrb[6].mxu1 }
 0x3fe   : > { %v870_v17 = vadd.f32 %v869_v16, %v691_v13  ;;  %v2086_v18 = vpop.f32.mrb[7].mxu1  ;;  %v1024_v19 = vsel %vm1023_vm6, %v867_v14, -inf }
 0x3ff   : > { %1025 = vmax.xlane.f32.xlu1 %v1024_v19 }
 0x400   : > { %v1027_v5 = vsel %vm1023_vm6, %v870_v17, -inf }
 0x401   : > { %1028 = vmax.xlane.f32.xlu0 %v1027_v5 }
 0x46a   : > { %v916_v6 = vpop.f32.mrb[0].mxu0  ;;  %v966_v20 = vpop.f32.mrb[8].mxu1 }
 0x46b   : > { %v917_v21 = vadd.f32 %v916_v6, %v690_v11  ;;  %v967_v22 = vadd.f32 %v966_v20, %v690_v11  ;;  %v2091_v23 = vpop.f32.mrb[1].mxu0  ;;  %v2097_v24 = vpop.f32.mrb[9].mxu1 }
 0x46c   : > { %v919_v25 = vpop.f32.mrb[2].mxu0  ;;  %v969_v26 = vpop.f32.mrb[10].mxu1 }
 0x46d   : > { %v920_v27 = vadd.f32 %v919_v25, %v691_v13  ;;  %v2092_v28 = vpop.f32.mrb[3].mxu0  ;;  %v2098_v29 = vpop.f32.mrb[11].mxu1  ;;  %v1030_v30 = vsel %vm1023_vm6, %v917_v21, -inf  ;;  %v1036_v31 = vsel %vm1023_vm6, %v967_v22, -inf  ;;  %v970_v32 = vadd.f32 %v969_v26, %v691_v13 }
 0x46e   : > { %1031 = vmax.xlane.f32.xlu0 %v1030_v30  ;;  %1037 = vmax.xlane.f32.xlu1 %v1036_v31 }
 0x46f   : > { %v1033_v33 = vsel %vm1023_vm6, %v920_v27, -inf  ;;  %v1039_v41 = vsel %vm1023_vm6, %v970_v32, -inf }
 0x472   : > { %v1016_v34 = vpop.f32.mrb[4].mxu0  ;;  %1034 = vmax.xlane.f32.xlu0 %v1033_v33 }
 0x473   : > { %v1017_v35 = vadd.f32 %v1016_v34, %v690_v11  ;;  %v2103_v36 = vpop.f32.mrb[5].mxu0 }
 0x474   : > { %v1019_v37 = vpop.f32.mrb[6].mxu0 }
 0x475   : > { %v1020_v38 = vadd.f32 %v1019_v37, %v691_v13  ;;  %v2104_v39 = vpop.f32.mrb[7].mxu0  ;;  %v1042_v40 = vsel %vm1023_vm6, %v1017_v35, -inf }
 0x476   : > { %1043 = vmax.xlane.f32.xlu1 %v1042_v40  ;;  %1040 = vmax.xlane.f32.xlu0 %v1039_v41 }
 0x477   : > { %v1045_v43 = vsel %vm1023_vm6, %v1020_v38, -inf }
 0x47a   : > { %1046 = vmax.xlane.f32.xlu0 %v1045_v43 }
 0x487   : > { %1116 = vrot.lane.b32.xlu1 %v2802_v42, %s2449_s25 }
 0x48c   : > { %v1026_v47 = vpop.xlane.xlu1 %1025 }
 0x48d   : > { %v1048_v48 = vsub.f32 %v867_v14, %v1026_v47  ;;  %v1308_v47 = vld [vmem:[%s2701_s29] sm:$0xf] }
 0x48e   : > { %v1029_v44 = vpop.xlane.xlu0 %1028 }
 0x48f   : > { %v1049_v45 = vsub.f32 %v870_v17, %v1029_v44  ;;  %v1056_v51 = vmul.f32 1.442695, %v1048_v48 }
 0x491   : > { %v1058_v46 = vmul.f32 1.442695, %v1049_v45 }
 0x493   : > { %2259 = vpow2.f32 %v1058_v46 }
 0x494   : > { %2261 = vpow2.f32 %v1056_v51 }
 0x49d   : > { %v2260_v52 = vpop.eup %2259 }
 0x49e   : > { %v1075_v53 = vsel %vm1023_vm6, %v2260_v52, 0.0  ;;  %v2262_v55 = vpop.eup %2261 }
 0x49f   : > { %1076 = vadd.xlane.f32.xlu0 %v1075_v53  ;;  %v1072_v56 = vsel %vm1023_vm6, %v2262_v55, 0.0 }
 0x4ab   : > { %1073 = vadd.xlane.f32.xlu1 %v1072_v56  ;;  %v1317_v56 = vsel %vm1315_vm7, %v1308_v47, 0 }
 0x4fb   : > { %v1032_v57 = vpop.xlane.xlu0 %1031  ;;  %v1038_v58 = vpop.xlane.xlu1 %1037 }
 0x4fc   : > { %v1050_v59 = vsub.f32 %v917_v21, %v1032_v57  ;;  %v1052_v42 = vsub.f32 %v967_v22, %v1038_v58 }
 0x4fe   : > { %v1060_v60 = vmul.f32 1.442695, %v1050_v59  ;;  %v1064_v61 = vmul.f32 1.442695, %v1052_v42 }
 0x4ff   : > { %v1035_v62 = vpop.xlane.xlu0 %1034 }
 0x500   : > { %2263 = vpow2.f32 %v1060_v60  ;;  %v1051_v63 = vsub.f32 %v920_v27, %v1035_v62  ;;  %v1309_v60 = vld [vmem:[%s2701_s29 + $0x4] sm:$0xf] }
 0x501   : > { %2265 = vpow2.f32 %v1064_v61  ;;  %v1364_v61 = vsel %vm1315_vm7, %v1309_v60, 0 }
 0x502   : > { %v1062_v0 = vmul.f32 1.442695, %v1051_v63  ;;  %v1310_v63 = vld [vmem:[%s2701_s29 + $0x8] sm:$0xf] }
 0x503   : > { %v1044_v1 = vpop.xlane.xlu1 %1043  ;;  %v1041_v7 = vpop.xlane.xlu0 %1040 }
 0x504   : > { %2267 = vpow2.f32 %v1062_v0  ;;  %v1054_v8 = vsub.f32 %v1017_v35, %v1044_v1  ;;  %v1053_v10 = vsub.f32 %v970_v32, %v1041_v7 }
 0x506   : > { %v1068_v11 = vmul.f32 1.442695, %v1054_v8  ;;  %v1066_v12 = vmul.f32 1.442695, %v1053_v10  ;;  %v1411_v10 = vsel %vm1315_vm7, %v1310_v63, 0 }
 0x507   : > { %v1117_v13 = vpop.permute.xlu1 %1116  ;;  %v1047_v14 = vpop.xlane.xlu0 %1046 }
 0x508   : > { %2269 = vpow2.f32 %v1068_v11  ;;  %v1055_v15 = vsub.f32 %v1020_v38, %v1047_v14  ;;  %2106 = vmatpush3.bf16.msra.mxu1 %v1117_v13 }
 0x509   : > { %2271 = vpow2.f32 %v1066_v12  ;;  %2117 = vmatprep.subr.bf16.mxu1 %v2442_v4  ;;  %v1311_v12 = vld [vmem:[%s2701_s29 + $0xc] sm:$0xf] }
 0x50a   : > { %v2264_v16 = vpop.eup %2263  ;;  %v1070_v17 = vmul.f32 1.442695, %v1055_v15 }
 0x50b   : > { %v1078_v18 = vsel %vm1023_vm6, %v2264_v16, 0.0  ;;  %v2266_v19 = vpop.eup %2265 }
 0x50c   : > { %2273 = vpow2.f32 %v1070_v17  ;;  %1079 = vadd.xlane.f32.xlu1 %v1078_v18  ;;  %v1084_v6 = vsel %vm1023_vm6, %v2266_v19, 0.0  ;;  %v1458_v17 = vsel %vm1315_vm7, %v1311_v12, 0 }
 0x50e   : > { %v2268_v5 = vpop.eup %2267 }
 0x50f   : > { %v1081_v20 = vsel %vm1023_vm6, %v2268_v5, 0.0 }
 0x510   : > { %1085 = vadd.xlane.f32.xlu1 %v1084_v6  ;;  %1082 = vadd.xlane.f32.xlu0 %v1081_v20 }
 0x512   : > { %v2270_v21 = vpop.eup %2269 }
 0x513   : > { %v2272_v22 = vpop.eup %2271  ;;  %v1090_v23 = vsel %vm1023_vm6, %v2270_v21, 0.0 }
 0x514   : > { %1091 = vadd.xlane.f32.xlu1 %v1090_v23  ;;  %v1087_v24 = vsel %vm1023_vm6, %v2272_v22, 0.0 }
 0x515   : > { %1088 = vadd.xlane.f32.xlu0 %v1087_v24 }
 0x516   : > { %v2274_v25 = vpop.eup %2273 }
 0x517   : > { %v1093_v26 = vsel %vm1023_vm6, %v2274_v25, 0.0 }
 0x519   : > { %1094 = vadd.xlane.f32.xlu0 %v1093_v26 }
 0x525   : > { %1210 = vrot.lane.b32.xlu1 %v2805_v49, %s2449_s25 }
 0x529   : > { %1257 = vrot.lane.b32.xlu1 %v2811_v54, %s2449_s25 }
 0x52c   : > { %v1077_v27 = vpop.xlane.xlu0 %1076 }
 0x52d   : > { %2275 = vrcp.f32 %v1077_v27 }
 0x52f   : > { %1163 = vrot.lane.b32.xlu0 %v2807_v50, %s2449_s25 }
 0x537   : > { %v2276_v29 = vpop.eup %2275 }
 0x538   : > { %v1074_v28 = vpop.xlane.xlu1 %1073  ;;  %v1099_v31 = vmul.f32 %v2276_v29, %v2260_v52 }
 0x539   : > { %2277 = vrcp.f32 %v1074_v28 }
 0x543   : > { %v2278_v30 = vpop.eup %2277 }
 0x544   : > { %v1097_v32 = vmul.f32 %v2278_v30, %v2262_v55 }
 0x546   : > { %v1112_v33 = vpack.c.bf16 %v1099_v31, %v1097_v32 }
 0x548   : > { %2108 = vmatmul.mubr.msk.bf16.vlgmr.msra.gmra.mrb[12].mxu1 %vm1023_vm6, %v1112_v33 }
 0x549   : > { %2119 = vmatprep.mubr.msk.bf16.mxu1 %vm2443_vm1, %v2442_v4 }
 0x599   : > { %v1080_v49 = vpop.xlane.xlu1 %1079 }
 0x59a   : > { %2279 = vrcp.f32 %v1080_v49 }
 0x59d   : > { %v1086_v54 = vpop.xlane.xlu1 %1085  ;;  %v1083_v34 = vpop.xlane.xlu0 %1082 }
 0x59e   : > { %2281 = vrcp.f32 %v1083_v34 }
 0x59f   : > { %2283 = vrcp.f32 %v1086_v54 }
 0x5a1   : > { %v1092_v50 = vpop.xlane.xlu1 %1091 }
 0x5a2   : > { %v1089_v35 = vpop.xlane.xlu0 %1088 }
 0x5a3   : > { %2285 = vrcp.f32 %v1089_v35 }
 0x5a4   : > { %2287 = vrcp.f32 %v1092_v50  ;;  %v2280_v38 = vpop.eup %2279 }
 0x5a5   : > { %v1211_v36 = vpop.permute.xlu1 %1210  ;;  %v1101_v40 = vmul.f32 %v2280_v38, %v2264_v16 }
 0x5a6   : > { %v1095_v37 = vpop.xlane.xlu0 %1094  ;;  %2118 = vmatpush3.bf16.msra.mxu1 %v1211_v36 }
 0x5a7   : > { %2289 = vrcp.f32 %v1095_v37  ;;  %2129 = vmatprep.subr.bf16.mxu1 %v2442_v4 }
 0x5a8   : > { %v2282_v39 = vpop.eup %2281 }
 0x5a9   : > { %v1103_v41 = vmul.f32 %v2282_v39, %v2268_v5  ;;  %v2284_v44 = vpop.eup %2283  ;;  %v1258_v52 = vpop.permute.xlu1 %1257 }
 0x5aa   : > { %v1164_v43 = vpop.permute.xlu0 %1163  ;;  %v1105_v48 = vmul.f32 %v2284_v44, %v2266_v19 }
 0x5ab   : > { %2112 = vmatpush3.bf16.msra.mxu0 %v1164_v43  ;;  %v1113_v45 = vpack.c.bf16 %v1103_v41, %v1101_v40  ;;  %v2012_v40 = vld [vmem:[%s653_s21] ss:$0 sm:$0xff] }
 0x5ac   : > { %2123 = vmatprep.subr.bf16.mxu0 %v2442_v4 }
 0x5ad   : > { %v2286_v46 = vpop.eup %2285 }
 0x5ae   : > { %v1107_v51 = vmul.f32 %v2286_v46, %v2272_v22  ;;  %2114 = vmatmul.mubr.msk.bf16.vlgmr.msra.gmra.mrb[8].mxu0 %vm1023_vm6, %v1113_v45  ;;  %v2288_v53 = vpop.eup %2287 }
 0x5af   : > { %2124 = vmatpush3.bf16.msra.mxu0 %v1258_v52  ;;  %2125 = vmatprep.mubr.msk.bf16.mxu0 %vm2443_vm1, %v2442_v4  ;;  %v1109_v58 = vmul.f32 %v2288_v53, %v2270_v21 }
 0x5b0   : > { %v1114_v55 = vpack.c.bf16 %v1107_v51, %v1105_v48  ;;  %2135 = vmatprep.subr.bf16.mxu0 %v2442_v4 }
 0x5b1   : > { %v2290_v57 = vpop.eup %2289 }
 0x5b2   : > { %v1111_v59 = vmul.f32 %v2290_v57, %v2274_v25  ;;  %2120 = vmatmul.mubr.msk.bf16.vlgmr.msra.gmra.mrb[16].mxu1 %vm1023_vm6, %v1114_v55 }
 0x5b3   : > { %2130 = vmatpush3.bf16.msra.mxu1 %v1317_v56  ;;  %2131 = vmatprep.mubr.msk.bf16.mxu1 %vm2443_vm1, %v2442_v4 }
 0x5b4   : > { %v1115_v42 = vpack.c.bf16 %v1111_v59, %v1109_v58  ;;  %2141 = vmatprep.subr.bf16.mxu1 %v2442_v4 }
 0x5b6   : > { %2126 = vmatmul.mubr.msk.bf16.vlgmr.msra.gmra.mrb[12].mxu0 %vm1023_vm6, %v1115_v42 }
 0x5b7   : > { %2137 = vmatprep.mubr.msk.bf16.mxu0 %vm2443_vm1, %v2442_v4  ;;  %2136 = vmatpush3.bf16.msra.mxu0 %v1364_v61 }
 0x5b8   : > { %2147 = vmatprep.subr.bf16.mxu0 %v2442_v4 }
 0x61b   : > { %v1156_v62 = vpop.f32.mrb[12].mxu1 }
 0x61c   : > { %v2109_v0 = vpop.f32.mrb[13].mxu1 }
 0x61d   : > { %v1159_v1 = vpop.f32.mrb[14].mxu1 }
 0x61e   : > { %v1304_v7 = vpack.c.bf16 %v1159_v1, %v1156_v62  ;;  %v2110_v8 = vpop.f32.mrb[15].mxu1  ;;  %v2250_v62 = vld [vmem:[%s2708_s20 + $0x8] sm:$0xff]  }
 0x620   : > { %2132 = vmatmul.mubr.msk.bf16.vlgmr.msra.gmra.mrb[20].mxu1 %vm825_vm3, %v1304_v7 }
 0x621   : > { %2142 = vmatpush3.bf16.msra.mxu1 %v1411_v10  ;;  %2143 = vmatprep.mubr.msk.bf16.mxu1 %vm2443_vm1, %v2442_v4 }
 0x622   : > { %2153 = vmatprep.subr.bf16.mxu1 %v2442_v4 }
 0x681   : > { %v1203_v11 = vpop.f32.mrb[8].mxu0 }
 0x682   : > { %v2115_v13 = vpop.f32.mrb[9].mxu0 }
 0x683   : > { %v1206_v14 = vpop.f32.mrb[10].mxu0  ;;  %v2013_v13 = vld [vmem:[%s3035_s22] ss:$0 sm:$0xff] }
 0x684   : > { %v1305_v15 = vpack.c.bf16 %v1206_v14, %v1203_v11  ;;  %v2116_v16 = vpop.f32.mrb[11].mxu0 }
 0x685   : > { %v1250_v18 = vpop.f32.mrb[16].mxu1 }
 0x686   : > { %v2121_v19 = vpop.f32.mrb[17].mxu1  ;;  %2138 = vmatmul.mubr.msk.bf16.vlgmr.msra.gmra.mrb[16].mxu0 %vm825_vm3, %v1305_v15 }
 0x687   : > { %v1253_v5 = vpop.f32.mrb[18].mxu1  ;;  %2148 = vmatpush3.bf16.msra.mxu0 %v1458_v17  ;;  %2149 = vmatprep.mubr.msk.bf16.mxu0 %vm2443_vm1, %v2442_v4  ;;  %v2014_v17 = vld [vmem:[%s659_s0] ss:$0 sm:$0xff]  ;;  %s3036_s0 = sld [smem:[#allocation17_spill]] (!%p2029_p7) }
 0x688   : > { %v1306_v6 = vpack.c.bf16 %v1253_v5, %v1250_v18  ;;  %v2122_v20 = vpop.f32.mrb[19].mxu1  ;;  %2161 = vmatprep.subr.bf16.mxu0 %v2442_v4 }
 0x689   : > { %v1297_v21 = vpop.f32.mrb[12].mxu0  ;;  %v2251_v20 = vld [vmem:[%s2748_s9] sm:$0xff]  }
 0x68a   : > { %v2127_v22 = vpop.f32.mrb[13].mxu0  ;;  %2144 = vmatmul.mubr.msk.bf16.vlgmr.msra.gmra.mrb[24].mxu1 %vm825_vm3, %v1306_v6 }
 0x68b   : > { %v1300_v23 = vpop.f32.mrb[14].mxu0  ;;  %2157 = vmatprep.mubr.msk.bf16.mxu1 %vm2443_vm1, %v2442_v4  ;;  %v2253_v22 = vld [vmem:[%s2748_s9 + $0x10] sm:$0xff]  }
 0x68c   : > { %v1307_v24 = vpack.c.bf16 %v1300_v23, %v1297_v21  ;;  %v2128_v25 = vpop.f32.mrb[15].mxu0  ;;  %v2252_v21 = vld [vmem:[%s2748_s9 + $0x8] sm:$0xff]   ;;  %v2254_v23 = vld [vmem:[%s2748_s9 + $0x18] sm:$0xff]  }
 0x68e   : > { %2150 = vmatmul.mubr.msk.bf16.vlgmr.msra.gmra.mrb[20].mxu0 %vm825_vm3, %v1307_v24  ;;  %v2015_v24 = vld [vmem:[%s563_s14] ss:$0 sm:$0xff] }
 0x68f   : > { %2169 = vmatprep.mubr.msk.bf16.mxu0 %vm2443_vm1, %v2442_v4  ;;  %2162 = vmatpush3.bf16.msra.mxu0 %v2251_v20 }
 0x690   : > { %2163 = vmatprep.subr.bf16.mxu0 %v2442_v4 }
 0x693   : > { %2164 = vmatpush3.bf16.msra.mxu0 %v2252_v21  ;;  %v2023_v21 = vld [vmem:[%s667_s18] ss:$0 sm:$0xff] }
 0x694   : > { %2165 = vmatprep.subr.bf16.mxu0 %v2442_v4 }
 0x697   : > { %2166 = vmatpush3.bf16.msra.mxu0 %v2253_v22 }
 0x698   : > { %2167 = vmatprep.subr.bf16.mxu0 %v2442_v4 }
 0x69b   : > { %2168 = vmatpush3.bf16.msra.mxu0 %v2254_v23 }
 0x6f3   : > { %v1353_v26 = vpop.f32.mrb[20].mxu1 }
 0x6f4   : > { %v2133_v27 = vpop.f32.mrb[21].mxu1 }
 0x6f5   : > { %v1356_v28 = vpop.f32.mrb[22].mxu1 }
 0x6f6   : > { %v2134_v29 = vpop.f32.mrb[23].mxu1 }
 0x759   : > { %v1400_v30 = vpop.f32.mrb[16].mxu0 }
 0x75a   : > { %v1501_v31 = vadd.f32 %v1400_v30, %v1353_v26  ;;  %v2139_v32 = vpop.f32.mrb[17].mxu0 }
 0x75b   : > { %v1403_v33 = vpop.f32.mrb[18].mxu0 }
 0x75c   : > { %v1504_v49 = vadd.f32 %v1403_v33, %v1356_v28  ;;  %v2140_v54 = vpop.f32.mrb[19].mxu0 }
 0x75d   : > { %v1447_v34 = vpop.f32.mrb[24].mxu1 }
 0x75e   : > { %v1502_v50 = vadd.f32 %v1501_v31, %v1447_v34  ;;  %v2145_v35 = vpop.f32.mrb[25].mxu1 }
 0x75f   : > { %v1450_v36 = vpop.f32.mrb[26].mxu1 }
 0x760   : > { %v1505_v37 = vadd.f32 %v1504_v49, %v1450_v36  ;;  %v2146_v38 = vpop.f32.mrb[27].mxu1 }
 0x761   : > { %v1494_v39 = vpop.f32.mrb[20].mxu0 }
 0x762   : > { %v1503_v41 = vadd.f32 %v1502_v50, %v1494_v39  ;;  %v2151_v43 = vpop.f32.mrb[21].mxu0 }
 0x763   : > { %v1497_v44 = vpop.f32.mrb[22].mxu0 }
 0x764   : > { %v1514_v45 = vadd.f32 %v2012_v40, %v1503_v41  ;;  %v1506_v46 = vadd.f32 %v1505_v37, %v1497_v44  ;;  %v2152_v47 = vpop.f32.mrb[23].mxu0 }
 0x766   : > { %v1515_v48 = vadd.f32 %v2012_v40, %v1506_v46  ;;  %v2910_v51 = vadd.f32 %v1514_v45, %v2762_v2 }
 0x768   : > { %1520 = vadd.xlane.f32.xlu1 %v2910_v51  ;;  %v2914_v52 = vadd.f32 %v1515_v48, %v2764_v3  ;;  %v2249_v3 = vld [vmem:[%s2708_s20] sm:$0xff]  }
 0x769   : > { %2154 = vmatpush3.bf16.msra.mxu1 %v2249_v3 }
 0x76a   : > { %1522 = vadd.xlane.f32.xlu0 %v2914_v52  ;;  %2155 = vmatprep.subr.bf16.mxu1 %v2442_v4 }
 0x76d   : > { %2156 = vmatpush3.bf16.msra.mxu1 %v2250_v62 }
 0x7f5   : > { %v1521_v53 = vpop.xlane.xlu1 %1520 }
 0x7f6   : > { %v1524_v55 = vmul.f32 0.03125, %v1521_v53 }
 0x7f7   : > { %v1523_v56 = vpop.xlane.xlu0 %1522 }
 0x7f8   : > { %v1526_v57 = vsub.f32 %v2910_v51, %v1524_v55  ;;  %v1525_v58 = vmul.f32 0.03125, %v1523_v56 }
 0x7fa   : > { %v1527_v59 = vsub.f32 %v2914_v52, %v1525_v58  ;;  %v1528_v2 = vmul.f32 %v2775_v9, %v1526_v57 }
 0x7fc   : > { %v1530_v42 = vmul.f32 %v1528_v2, %v1528_v2  ;;  %v1529_v60 = vmul.f32 %v2775_v9, %v1527_v59 }
 0x7fe   : > { %1532 = vadd.xlane.f32.xlu0 %v1530_v42  ;;  %v1531_v61 = vmul.f32 %v1529_v60, %v1529_v60 }
 0x802   : > { %1534 = vadd.xlane.f32.xlu0 %v1531_v61 }
 0x88b   : > { %v1533_v63 = vpop.xlane.xlu0 %1532 }
 0x88c   : > { %v1536_v0 = vmul.f32 0.03125, %v1533_v63 }
 0x88e   : > { %v1538_v1 = vadd.f32 1e-05, %v1536_v0 }
 0x88f   : > { %v1535_v7 = vpop.xlane.xlu0 %1534 }
 0x890   : > { %2291 = vrsqrt.f32 %v1538_v1  ;;  %v1537_v8 = vmul.f32 0.03125, %v1535_v7 }
 0x892   : > { %v1539_v10 = vadd.f32 1e-05, %v1537_v8 }
 0x894   : > { %2293 = vrsqrt.f32 %v1539_v10 }
 0x89a   : > { %v2292_v11 = vpop.eup %2291 }
 0x89b   : > { %v1542_v12 = vmul.f32 %v2292_v11, %v1526_v57 }
 0x89d   : > { %v1550_v15 = vmul.f32 %v2013_v13, %v1542_v12 }
 0x89e   : > { %v2294_v14 = vpop.eup %2293 }
 0x89f   : > { %v1543_v16 = vmul.f32 %v2294_v14, %v1527_v59  ;;  %v1558_v19 = vadd.f32 %v2014_v17, %v1550_v15 }
 0x8a1   : > { %v1551_v18 = vmul.f32 %v2013_v13, %v1543_v16 }
 0x8a3   : > { %v1559_v5 = vadd.f32 %v2014_v17, %v1551_v18 }
 0x8a5   : > { %v1560_v6 = vpack.c.bf16 %v1559_v5, %v1558_v19 }
 0x8a7   : > { %2158 = vmatmul.mubr.msk.bf16.vlgmr.msra.gmra.mrb[28].mxu1 %vm753_vm2, %v1560_v6 }
 0x97a   : > { %v1621_v25 = vpop.f32.mrb[28].mxu1 }
 0x97b   : > { %v1622_v26 = vadd.f32 %v2015_v24, %v1621_v25  ;;  %v2159_v27 = vpop.f32.mrb[29].mxu1 }
 0x97c   : > { %v1624_v28 = vpop.f32.mrb[30].mxu1 }
 0x97d   : > { %v1628_v29 = vmul.f32 0.70710677, %v1622_v26  ;;  %v1625_v30 = vadd.f32 %v2015_v24, %v1624_v28  ;;  %v2160_v31 = vpop.f32.mrb[31].mxu1  ;;  %v1676_v17 = vmul.f32 0.5, %v1622_v26 }
 0x97f   : > { %v1630_v32 = vand.u32 2147483647, %v1628_v29  ;;  %v1629_v33 = vmul.f32 0.70710677, %v1625_v30  ;;  %vm1670_vm8 = vcmp.ge.f32.partialorder %v1628_v29, 0.0  ;;  %v1677_v18 = vmul.f32 0.5, %v1625_v30 }
 0x981   : > { %v1632_v49 = vmul.f32 0.3275911, %v1630_v32  ;;  %v1631_v54 = vand.u32 2147483647, %v1629_v33  ;;  %v1658_v4 = vsub.f32 0.0, %v1630_v32  ;;  %vm1671_vm9 = vcmp.ge.f32.partialorder %v1629_v33, 0.0 }
 0x983   : > { %v1634_v34 = vadd.f32 1.0, %v1632_v49  ;;  %v1633_v50 = vmul.f32 0.3275911, %v1631_v54  ;;  %v1659_v36 = vsub.f32 0.0, %v1631_v54  ;;  %v1660_v38 = vmul.f32 %v1658_v4, %v1630_v32 }
 0x985   : > { %2295 = vrcp.f32 %v1634_v34  ;;  %v1635_v35 = vadd.f32 1.0, %v1633_v50  ;;  %v1661_v43 = vmul.f32 %v1659_v36, %v1631_v54  ;;  %v1662_v44 = vmul.f32 1.442695, %v1660_v38 }
 0x987   : > { %2297 = vrcp.f32 %v1635_v35  ;;  %v1664_v53 = vmul.f32 1.442695, %v1661_v43 }
 0x988   : > { %2299 = vpow2.f32 %v1662_v44 }
 0x989   : > { %2301 = vpow2.f32 %v1664_v53 }
 0x98f   : > { %v2296_v37 = vpop.eup %2295 }
 0x990   : > { %v1640_v39 = vmul.f32 1.0614054, %v2296_v37 }
 0x991   : > { %v2298_v40 = vpop.eup %2297 }
 0x992   : > { %v2019_v41 = vadd.f32 -1.4531521, %v1640_v39  ;;  %v1641_v45 = vmul.f32 1.0614054, %v2298_v40  ;;  %v2300_v62 = vpop.eup %2299 }
 0x993   : > { %v2302_v7 = vpop.eup %2301 }
 0x994   : > { %v1644_v46 = vmul.f32 %v2296_v37, %v2019_v41  ;;  %v2020_v47 = vadd.f32 -1.4531521, %v1641_v45  ;;  %v2030_v41 = vld [vmem:[%s3036_s0] ss:$0 sm:$0xff] (!%p2029_p7) }
 0x996   : > { %v1646_v48 = vadd.f32 1.4214138, %v1644_v46  ;;  %v1645_v55 = vmul.f32 %v2298_v40, %v2020_v47 }
 0x998   : > { %v1648_v56 = vmul.f32 %v2296_v37, %v1646_v48  ;;  %v1647_v57 = vadd.f32 1.4214138, %v1645_v55 }
 0x99a   : > { %v2021_v58 = vadd.f32 -0.28449672, %v1648_v56  ;;  %v1649_v59 = vmul.f32 %v2298_v40, %v1647_v57 }
 0x99c   : > { %v1652_v2 = vmul.f32 %v2296_v37, %v2021_v58  ;;  %v2022_v42 = vadd.f32 -0.28449672, %v1649_v59 }
 0x99e   : > { %v1654_v60 = vadd.f32 0.2548296, %v1652_v2  ;;  %v1653_v61 = vmul.f32 %v2298_v40, %v2022_v42 }
 0x9a0   : > { %v1656_v3 = vmul.f32 %v2296_v37, %v1654_v60  ;;  %v1655_v63 = vadd.f32 0.2548296, %v1653_v61 }
 0x9a2   : > { %v1666_v0 = vmul.f32 %v2300_v62, %v1656_v3  ;;  %v1657_v1 = vmul.f32 %v2298_v40, %v1655_v63 }
 0x9a4   : > { %v1668_v8 = vsub.f32 1.0, %v1666_v0  ;;  %v1667_v10 = vmul.f32 %v2302_v7, %v1657_v1 }
 0x9a6   : > { %v1672_v11 = vsub.f32 0.0, %v1668_v8  ;;  %v1669_v12 = vsub.f32 1.0, %v1667_v10 }
 0x9a8   : > { %v1674_v13 = vsel %vm1670_vm8, %v1668_v8, %v1672_v11  ;;  %v1673_v14 = vsub.f32 0.0, %v1669_v12 }
 0x9a9   : > { %v1678_v15 = vadd.f32 1.0, %v1674_v13 }
 0x9aa   : > { %v1675_v16 = vsel %vm1671_vm9, %v1669_v12, %v1673_v14 }
 0x9ab   : > { %v1679_v19 = vadd.f32 1.0, %v1675_v16  ;;  %v1680_v5 = vmul.f32 %v1678_v15, %v1676_v17 }
 0x9ad   : > { %v1681_v6 = vmul.f32 %v1679_v19, %v1677_v18 }
 0x9af   : > { %v1682_v20 = vpack.c.bf16 %v1681_v6, %v1680_v5 }
 0x9b1   : > { %2170 = vmatmul.mubr.msk.bf16.vlgmr.msra.gmra.mrb[24].mxu0 %vm1722_vm10, %v1682_v20 }
 0xa84   : > { %v1760_v22 = vpop.f32.mrb[24].mxu0 }
 0xa85   : > { %v1761_v23 = vadd.f32 %v2023_v21, %v1760_v22  ;;  %v2171_v24 = vpop.f32.mrb[25].mxu0  ;;  %1774 = sbr.rel (%p2029_p7) target bundleno = 3015 (0xbc7), region = 96 }
 0xa86   : > { %v1763_v25 = vpop.f32.mrb[26].mxu0 }
 0xa87   : > { %v1767_v27 = vadd.f32 %v1761_v23, %v2910_v51  ;;  %v1764_v28 = vadd.f32 %v2023_v21, %v1763_v25  ;;  %v2172_v26 = vpop.f32.mrb[27].mxu0 }
 0xa89   : > { %1769 = vst [vmem:[#allocation2] sm:$0xff] %v1767_v27  ;;  %v1768_v29 = vadd.f32 %v1764_v28, %v2914_v52  ;;  %1777 = vadd.xlane.f32.xlu0 (!%p2029_p7), %v1767_v27 }
 0xa8b   : > { %1770 = vst [vmem:[#allocation2 + $0x8] sm:$0xff] %v1768_v29 }
 0xa8d   : > { %1779 = vadd.xlane.f32.xlu0 %v1768_v29 }
 0xb16   : > { %v1778_v30 = vpop.xlane.xlu0 %1777 }
 0xb17   : > { %v1781_v31 = vmul.f32 0.03125, %v1778_v30 }
 0xb19   : > { %v1783_v32 = vsub.f32 %v1767_v27, %v1781_v31 }
 0xb1a   : > { %v1780_v33 = vpop.xlane.xlu0 %1779 }
 0xb1b   : > { %v1782_v49 = vmul.f32 0.03125, %v1780_v33  ;;  %v1785_v54 = vmul.f32 %v2775_v9, %v1783_v32 }
 0xb1d   : > { %v1784_v34 = vsub.f32 %v1768_v29, %v1782_v49  ;;  %v1787_v51 = vmul.f32 %v1785_v54, %v1785_v54 }
 0xb1f   : > { %1789 = vadd.xlane.f32.xlu1 %v1787_v51  ;;  %v1786_v50 = vmul.f32 %v2775_v9, %v1784_v34  ;;  %v2031_v9 = vld [vmem:[%s3037_s19] ss:$0 sm:$0xff] }
 0xb21   : > { %v1788_v35 = vmul.f32 %v1786_v50, %v1786_v50 }
 0xb23   : > { %1791 = vadd.xlane.f32.xlu1 %v1788_v35 }
 0xbac   : > { %v1790_v52 = vpop.xlane.xlu1 %1789 }
 0xbad   : > { %v1793_v4 = vmul.f32 0.03125, %v1790_v52 }
 0xbaf   : > { %v1795_v36 = vadd.f32 1e-05, %v1793_v4 }
 0xbb0   : > { %v1792_v37 = vpop.xlane.xlu1 %1791 }
 0xbb1   : > { %2303 = vrsqrt.f32 %v1795_v36  ;;  %v1794_v38 = vmul.f32 0.03125, %v1792_v37 }
 0xbb3   : > { %v1796_v39 = vadd.f32 1e-05, %v1794_v38 }
 0xbb5   : > { %2305 = vrsqrt.f32 %v1796_v39 }
 0xbbb   : > { %v2304_v40 = vpop.eup %2303 }
 0xbbc   : > { %v1799_v43 = vmul.f32 %v2304_v40, %v1783_v32 }
 0xbbe   : > { %v1807_v44 = vmul.f32 %v2030_v41, %v1799_v43 }
 0xbbf   : > { %v2306_v45 = vpop.eup %2305 }
 0xbc0   : > { %v1815_v46 = vadd.f32 %v2031_v9, %v1807_v44  ;;  %v1800_v47 = vmul.f32 %v2306_v45, %v1784_v34 }
 0xbc2   : > { %1817 = vst [vmem:[%s3038_s27] sm:$0xff] %v1815_v46  ;;  %v1808_v48 = vmul.f32 %v2030_v41, %v1800_v47 }
 0xbc4   : > { %v1816_v53 = vadd.f32 %v2031_v9, %v1808_v48 }
 0xbc6   : > { %1818 = vst [vmem:[%s3038_s27 + $0x8] sm:$0xff] %v1816_v53 }
 0xbc7 PF: > { %s3039_s16 = sld [smem:[#allocation11_spill]]  ;;  %s3040_s25 = sld [smem:[#allocation10_spill]] }
 0xbc8   : > { %s3041_s15 = sld [smem:[#allocation12_spill]]  ;;  %s3042_s29 = smov %s2427_s30 }
 0xbcd   : > { %p27_p9 = scmp.ge.s32.totalorder %s3039_s16, 4   ;;  %s3043_s30 = smov %s3040_s25 }
 0xbcf   :  { %29 = sbr.rel (!%p27_p9) target bundleno = 13 (0xd), region = 168 }
 0xbd6   :  { %1830 = vsyncpa [#allocation4], 1 }
 0xbd7   :  { %1832 = vsyncpa [#allocation4 + $0x1], 1 }
 0xbd8   :  { %1833 = vsyncpa [#allocation6], 1 }
 0xbd9   :  { %1835 = vsyncpa [#allocation6 + $0x1], 1 }

</bundles_post_ra>
